<compile_context>
chip_gen: v5e
topology: v5e:2x2
jax: 0.10.0
libtpu: 0.0.40
codegen_flags: <defaults>
</compile_context>

<pallas_src>
import jax
import jax.numpy as jnp
from jax import lax
from jax.experimental import pallas as pl
from jax.experimental.pallas import tpu as pltpu

H = 10  # GRU hidden size (hard-coded inside the PyTorch module)


def word_attention_kernel(xp_ref, whh_ref, bhh_ref, watt_ref, batt_ref, wctx_ref,
                          s_ref, outf_scr, outb_scr):
    W, S, B, _ = xp_ref.shape
    HH = whh_ref.shape[0]          # 2H (combined fwd|bwd hidden width)
    Hh = HH // 2                   # H

    whh = whh_ref[...]             # (2H, 6H) block-diagonal recurrent weight
    bhh = bhh_ref[...]             # (1, 6H)  recurrent bias, gate-major [f|b]

    # ---- fused bidirectional GRU recurrence ------------------------------- #
    def word_body(w, h):
        # h: (B, 2H) = [h_f | h_b]; carried across time AND across the word loop
        def time_body(t, h):
            tb = S - 1 - t
            gi = xp_ref[w, t]                                   # (B, 6H) input gates
            gh = jnp.dot(h, whh, preferred_element_type=jnp.float32) + bhh
            rz = jax.nn.sigmoid(gi[:, :2 * HH] + gh[:, :2 * HH])  # (B, 4H) [r | z]
            r = rz[:, :HH]
            z = rz[:, HH:]
            n = jnp.tanh(gi[:, 2 * HH:] + r * gh[:, 2 * HH:])
            h_new = (1.0 - z) * n + z * h                       # (B, 2H)
            outf_scr[w, t] = h_new[:, :Hh]                      # fwd output at time t
            outb_scr[w, tb] = h_new[:, Hh:]                     # bwd output at time S-1-t
            return h_new

        return lax.fori_loop(0, S, time_body, h, unroll=True)

    h0 = jnp.zeros((B, HH), jnp.float32)
    lax.fori_loop(0, W, word_body, h0)     # hidden state threads across words

    # ---- batched attention + softmax over words + weighted sum ------------ #
    N = W * S
    of = outf_scr[...]                                # (W, S, B, H)
    ob = outb_scr[...]                                # (W, S, B, H)
    of2 = of.reshape(N, B, Hh)
    ob2 = ob.reshape(N, B, Hh)
    waf = jnp.broadcast_to(watt_ref[0], (N, HH, Hh))  # (N, 2H, H) fwd half of att_w
    wab = jnp.broadcast_to(watt_ref[1], (N, HH, Hh))  # (N, 2H, H) bwd half of att_w
    u = jnp.tanh(
        jnp.einsum('nbj,nkj->nbk', of2, waf, preferred_element_type=jnp.float32)
        + jnp.einsum('nbj,nkj->nbk', ob2, wab, preferred_element_type=jnp.float32)
        + batt_ref[...])                              # (N, B, 2H)
    logits = jnp.sum(u * wctx_ref[...], axis=-1, keepdims=True)   # (N, B, 1)
    logits = logits.reshape(W, S, B, 1)

    m = jnp.max(logits, axis=0, keepdims=True)
    e = jnp.exp(logits - m)
    a = e / jnp.sum(e, axis=0, keepdims=True)         # (W, S, B, 1) softmax over words
    s_ref[0] = jnp.sum(a * of, axis=0)                # (S, B, H) fwd half of s
    s_ref[1] = jnp.sum(a * ob, axis=0)                # (S, B, H) bwd half of s


# --------------------------------------------------------------------------- #
# Parameter setup / wrapper (plain-JAX glue)
# --------------------------------------------------------------------------- #

def init_params(key, embedding_size):
    """Deterministic synthetic parameters with PyTorch-default-like uniform init."""
    E = embedding_size
    ks = jax.random.split(key, 11)
    g = 1.0 / (H ** 0.5)
    l = 1.0 / ((2 * H) ** 0.5)

    def u(k, shape, bound):
        return jax.random.uniform(k, shape, jnp.float32, -bound, bound)

    return dict(
        weight_ih_f=u(ks[0], (3 * H, E), g), weight_hh_f=u(ks[1], (3 * H, H), g),
        bias_ih_f=u(ks[2], (3 * H,), g),     bias_hh_f=u(ks[3], (3 * H,), g),
        weight_ih_b=u(ks[4], (3 * H, E), g), weight_hh_b=u(ks[5], (3 * H, H), g),
        bias_ih_b=u(ks[6], (3 * H,), g),     bias_hh_b=u(ks[7], (3 * H,), g),
        att_w=u(ks[8], (2 * H, 2 * H), l),   att_b=u(ks[9], (2 * H,), l),
        ctx_w=u(ks[10], (1, 2 * H), l),
    )


@jax.jit
def word_attention_forward(x, params):
    """x: (B, S, W, E) float32 -> (B, S, 2H) float32 (matches the PyTorch forward)."""
    B, S, W, E = x.shape
    f32 = jnp.float32
    xk = jnp.transpose(x, (2, 1, 0, 3)).astype(f32)             # (W, S, B, E)

    # Hoisted input projections (one bulk matmul per direction), b_ih folded in.
    pf = xk @ params["weight_ih_f"].T + params["bias_ih_f"]     # (W,S,B,3H) cols [r,z,n]
    pb = xk @ params["weight_ih_b"].T + params["bias_ih_b"]
    pbr = pb[:, ::-1]                                           # time-reverse for bwd dir
    # Gate-major packing: [r_f, r_b, z_f, z_b, n_f, n_b]
    xp = jnp.concatenate([pf[..., 0:H],     pbr[..., 0:H],
                          pf[..., H:2 * H], pbr[..., H:2 * H],
                          pf[..., 2 * H:],  pbr[..., 2 * H:]], axis=-1)  # (W,S,B,6H)

    # Fused block-diagonal recurrent weight (2H, 6H) and recurrent bias (1, 6H).
    whhf, whhb = params["weight_hh_f"], params["weight_hh_b"]
    zed = jnp.zeros((H, H), f32)

    def gate_block(gf, gb):      # gf/gb: (H_out, H_in) PyTorch row convention
        return jnp.concatenate(
            [jnp.concatenate([gf.T, zed], axis=1),
             jnp.concatenate([zed, gb.T], axis=1)], axis=0)     # (2H, 2H)

    whh_big = jnp.concatenate(
        [gate_block(whhf[0:H],         whhb[0:H]),
         gate_block(whhf[H:2 * H],     whhb[H:2 * H]),
         gate_block(whhf[2 * H:3 * H], whhb[2 * H:3 * H])], axis=1)      # (2H, 6H)
    bhf, bhb = params["bias_hh_f"], params["bias_hh_b"]
    bhh_big = jnp.concatenate([bhf[0:H], bhb[0:H],
                               bhf[H:2 * H], bhb[H:2 * H],
                               bhf[2 * H:], bhb[2 * H:]])[None, :]       # (1, 6H)

    att_w = params["att_w"]                                     # (2H_out, 2H_in)
    watt = jnp.stack([att_w[:, :H], att_w[:, H:]], axis=0)      # (2, 2H, H) fwd/bwd halves
    batt = params["att_b"][None, :]                             # (1, 2H)
    wctx = params["ctx_w"]                                      # (1, 2H)

    # Everything fits easily in VMEM at these sizes; for large shapes raise
    # vmem_limit_bytes via pltpu.CompilerParams or stream over W with a grid.
    vmem = pl.BlockSpec(memory_space=pltpu.MemorySpace.VMEM)
    s2 = pl.pallas_call(
        word_attention_kernel,
        out_shape=jax.ShapeDtypeStruct((2, S, B, H), jnp.float32),
        in_specs=[vmem] * 6,
        out_specs=vmem,
        scratch_shapes=[pltpu.VMEM((W, S, B, H), jnp.float32),   # fwd GRU outputs
                        pltpu.VMEM((W, S, B, H), jnp.float32)],  # bwd GRU outputs
    )(xp, whh_big, bhh_big, watt, batt, wctx)

    s = jnp.concatenate([s2[0], s2[1]], axis=-1)                # (S, B, 2H)
    return jnp.transpose(s, (1, 0, 2))                          # (B, S, 2H)


# --------------------------------------------------------------------------- #
# Pure-JAX reference (mirrors the PyTorch forward exactly)
# --------------------------------------------------------------------------- #

def word_attention_reference(x, params):
    B, S, W, E = x.shape

    def cell(xt, h, wih, whh, bih, bhh):
        gi = xt @ wih.T + bih
        gh = h @ whh.T + bhh
        i_r, i_z, i_n = jnp.split(gi, 3, axis=1)
        h_r, h_z, h_n = jnp.split(gh, 3, axis=1)
        r = jax.nn.sigmoid(i_r + h_r)
        z = jax.nn.sigmoid(i_z + h_z)
        n = jnp.tanh(i_n + r * h_n)
        return (1.0 - z) * n + z * h

    h_f = jnp.zeros((B, H), jnp.float32)
    h_b = jnp.zeros((B, H), jnp.float32)
    outs, logits = [], []
    for w in range(W):
        xs = x[:, :, w, :]
        fwd = []
        for t in range(S):
            h_f = cell(xs[:, t], h_f, params["weight_ih_f"], params["weight_hh_f"],
                       params["bias_ih_f"], params["bias_hh_f"])
            fwd.append(h_f)
        bwd = [None] * S
        for t in range(S - 1, -1, -1):
            h_b = cell(xs[:, t], h_b, params["weight_ih_b"], params["weight_hh_b"],
                       params["bias_ih_b"], params["bias_hh_b"])
            bwd[t] = h_b
        out = jnp.concatenate([jnp.stack(fwd, 1), jnp.stack(bwd, 1)], axis=-1)  # (B,S,2H)
        u = jnp.tanh(out @ params["att_w"].T + params["att_b"])
        outs.append(out)
        logits.append(u @ params["ctx_w"].T)                                    # (B,S,1)
    out_all = jnp.stack(outs, axis=2)                       # (B, S, W, 2H)
    log_all = jnp.concatenate(logits, axis=2)               # (B, S, W)
    a = jax.nn.softmax(log_all, axis=2)[..., None]          # (B, S, W, 1)
    return jnp.sum(a * out_all, axis=2)                     # (B, S, 2H)


if __name__ == "__main__":
    # TODO(synk): GRU_dropout is a no-op in the reference module (num_layers=1,
    # inference path), so it is intentionally not modeled.
    B, S, W, E = 2, 6, 4, 16
    key = jax.random.PRNGKey(0)
    kx, kp = jax.random.split(key)
    x = jax.random.normal(kx, (B, S, W, E), jnp.float32)
    params = init_params(kp, E)

    s = word_attention_forward(x, params)
    s = jax.block_until_ready(s)

    s_ref = word_attention_reference(x, params)
    assert s.shape == (B, S, 2 * H), s.shape
    max_err = float(jnp.max(jnp.abs(s - s_ref)))
    assert jnp.allclose(s, s_ref, atol=1e-4, rtol=1e-4), max_err
    print("KERNEL_OK")
</pallas_src>

<mosaic_0001>
module attributes {stable_mosaic.version = 11 : i64} {
  func.func @word_attention_kernel(%arg0: memref<4x6x2x60xf32, #tpu.memory_space<vmem>>, %arg1: memref<20x60xf32, #tpu.memory_space<vmem>>, %arg2: memref<1x60xf32, #tpu.memory_space<vmem>>, %arg3: memref<2x20x10xf32, #tpu.memory_space<vmem>>, %arg4: memref<1x20xf32, #tpu.memory_space<vmem>>, %arg5: memref<1x20xf32, #tpu.memory_space<vmem>>, %arg6: memref<2x6x2x10xf32, #tpu.memory_space<vmem>>, %arg7: memref<4x6x2x10xf32, #tpu.memory_space<vmem>>, %arg8: memref<4x6x2x10xf32, #tpu.memory_space<vmem>>) attributes {dimension_semantics = [], scalar_prefetch = 0 : i64, scratch_operands = 2 : i64, tpu.core_type = #tpu.core_type<tc>} {
    %c0 = arith.constant 0 : index
    %c0_0 = arith.constant 0 : index
    %0 = vector.load %arg1[%c0, %c0_0] : memref<20x60xf32, #tpu.memory_space<vmem>>, vector<20x60xf32>
    %c0_1 = arith.constant 0 : index
    %c0_2 = arith.constant 0 : index
    %1 = vector.load %arg2[%c0_1, %c0_2] : memref<1x60xf32, #tpu.memory_space<vmem>>, vector<1x60xf32>
    %cst = arith.constant 0.000000e+00 : f32
    %2 = vector.broadcast %cst : f32 to vector<2x20xf32>
    %c0_i32 = arith.constant 0 : i32
    %c4_i32 = arith.constant 4 : i32
    %3 = arith.addi %c0_i32, %c4_i32 : i32
    %c1_i32 = arith.constant 1 : i32
    %4 = scf.for %arg9 = %c0_i32 to %3 step %c1_i32 iter_args(%arg10 = %2) -> (vector<2x20xf32>)  : i32 {
      %c0_i32_36 = arith.constant 0 : i32
      %c5_i32 = arith.constant 5 : i32
      %53 = arith.subi %c5_i32, %c0_i32_36 : i32
      %54 = arith.index_cast %arg9 : i32 to index
      %55 = arith.index_cast %c0_i32_36 : i32 to index
      %c0_37 = arith.constant 0 : index
      %c0_38 = arith.constant 0 : index
      %56 = vector.load %arg0[%54, %55, %c0_37, %c0_38] : memref<4x6x2x60xf32, #tpu.memory_space<vmem>>, vector<1x1x2x60xf32>
      %57 = vector.shape_cast %56 : vector<1x1x2x60xf32> to vector<2x60xf32>
      %cst_39 = arith.constant dense<0.000000e+00> : vector<2x60xf32>
      %58 = tpu.matmul %arg10, %0, %cst_39 {dimension_numbers = #tpu.dot_dimension_numbers<[1], [0], [0], [1], [0, 0, 1, 1], [], []>} : vector<2x20xf32>, vector<20x60xf32>, vector<2x60xf32> -> vector<2x60xf32>
      %59 = vector.broadcast %1 : vector<1x60xf32> to vector<2x60xf32>
      %60 = arith.addf %58, %59 : vector<2x60xf32>
      %61 = vector.extract_strided_slice %57 {offsets = [0, 0], sizes = [2, 40], strides = [1, 1]} : vector<2x60xf32> to vector<2x40xf32>
      %62 = vector.extract_strided_slice %60 {offsets = [0, 0], sizes = [2, 40], strides = [1, 1]} : vector<2x60xf32> to vector<2x40xf32>
      %63 = arith.addf %61, %62 : vector<2x40xf32>
      %64 = arith.negf %63 : vector<2x40xf32>
      %65 = math.exp %64 : vector<2x40xf32>
      %cst_40 = arith.constant 1.000000e+00 : f32
      %66 = vector.broadcast %cst_40 : f32 to vector<2x40xf32>
      %67 = arith.addf %66, %65 : vector<2x40xf32>
      %68 = arith.divf %66, %67 : vector<2x40xf32>
      %69 = vector.extract_strided_slice %68 {offsets = [0, 0], sizes = [2, 20], strides = [1, 1]} : vector<2x40xf32> to vector<2x20xf32>
      %70 = vector.extract_strided_slice %68 {offsets = [0, 20], sizes = [2, 20], strides = [1, 1]} : vector<2x40xf32> to vector<2x20xf32>
      %71 = vector.extract_strided_slice %57 {offsets = [0, 40], sizes = [2, 20], strides = [1, 1]} : vector<2x60xf32> to vector<2x20xf32>
      %72 = vector.extract_strided_slice %60 {offsets = [0, 40], sizes = [2, 20], strides = [1, 1]} : vector<2x60xf32> to vector<2x20xf32>
      %73 = arith.mulf %69, %72 : vector<2x20xf32>
      %74 = arith.addf %71, %73 : vector<2x20xf32>
      %75 = math.tanh %74 : vector<2x20xf32>
      %cst_41 = arith.constant 1.000000e+00 : f32
      %76 = vector.broadcast %cst_41 : f32 to vector<2x20xf32>
      %77 = arith.subf %76, %70 : vector<2x20xf32>
      %78 = arith.mulf %77, %75 : vector<2x20xf32>
      %79 = arith.mulf %70, %arg10 : vector<2x20xf32>
      %80 = arith.addf %78, %79 : vector<2x20xf32>
      %81 = vector.extract_strided_slice %80 {offsets = [0, 0], sizes = [2, 10], strides = [1, 1]} : vector<2x20xf32> to vector<2x10xf32>
      %82 = arith.index_cast %arg9 : i32 to index
      %83 = arith.index_cast %c0_i32_36 : i32 to index
      %c0_42 = arith.constant 0 : index
      %c0_43 = arith.constant 0 : index
      %84 = vector.load %arg7[%82, %83, %c0_42, %c0_43] : memref<4x6x2x10xf32, #tpu.memory_space<vmem>>, vector<1x1x2x10xf32>
      %85 = vector.shape_cast %84 : vector<1x1x2x10xf32> to vector<2x10xf32>
      %86 = vector.shape_cast %81 : vector<2x10xf32> to vector<1x1x2x10xf32>
      tpu.vector_store %arg7[%82, %83, %c0_42, %c0_43], %86 {strides = array<i32>} : memref<4x6x2x10xf32, #tpu.memory_space<vmem>>, vector<1x1x2x10xf32>,
      %87 = vector.extract_strided_slice %80 {offsets = [0, 10], sizes = [2, 10], strides = [1, 1]} : vector<2x20xf32> to vector<2x10xf32>
      %88 = arith.index_cast %arg9 : i32 to index
      %89 = arith.index_cast %53 : i32 to index
      %c0_44 = arith.constant 0 : index
      %c0_45 = arith.constant 0 : index
      %90 = vector.load %arg8[%88, %89, %c0_44, %c0_45] : memref<4x6x2x10xf32, #tpu.memory_space<vmem>>, vector<1x1x2x10xf32>
      %91 = vector.shape_cast %90 : vector<1x1x2x10xf32> to vector<2x10xf32>
      %92 = vector.shape_cast %87 : vector<2x10xf32> to vector<1x1x2x10xf32>
      tpu.vector_store %arg8[%88, %89, %c0_44, %c0_45], %92 {strides = array<i32>} : memref<4x6x2x10xf32, #tpu.memory_space<vmem>>, vector<1x1x2x10xf32>,
      %c1_i32_46 = arith.constant 1 : i32
      %c5_i32_47 = arith.constant 5 : i32
      %93 = arith.subi %c5_i32_47, %c1_i32_46 : i32
      %94 = arith.index_cast %arg9 : i32 to index
      %95 = arith.index_cast %c1_i32_46 : i32 to index
      %c0_48 = arith.constant 0 : index
      %c0_49 = arith.constant 0 : index
      %96 = vector.load %arg0[%94, %95, %c0_48, %c0_49] : memref<4x6x2x60xf32, #tpu.memory_space<vmem>>, vector<1x1x2x60xf32>
      %97 = vector.shape_cast %96 : vector<1x1x2x60xf32> to vector<2x60xf32>
      %cst_50 = arith.constant dense<0.000000e+00> : vector<2x60xf32>
      %98 = tpu.matmul %80, %0, %cst_50 {dimension_numbers = #tpu.dot_dimension_numbers<[1], [0], [0], [1], [0, 0, 1, 1], [], []>} : vector<2x20xf32>, vector<20x60xf32>, vector<2x60xf32> -> vector<2x60xf32>
      %99 = vector.broadcast %1 : vector<1x60xf32> to vector<2x60xf32>
      %100 = arith.addf %98, %99 : vector<2x60xf32>
      %101 = vector.extract_strided_slice %97 {offsets = [0, 0], sizes = [2, 40], strides = [1, 1]} : vector<2x60xf32> to vector<2x40xf32>
      %102 = vector.extract_strided_slice %100 {offsets = [0, 0], sizes = [2, 40], strides = [1, 1]} : vector<2x60xf32> to vector<2x40xf32>
      %103 = arith.addf %101, %102 : vector<2x40xf32>
      %104 = arith.negf %103 : vector<2x40xf32>
      %105 = math.exp %104 : vector<2x40xf32>
      %cst_51 = arith.constant 1.000000e+00 : f32
      %106 = vector.broadcast %cst_51 : f32 to vector<2x40xf32>
      %107 = arith.addf %106, %105 : vector<2x40xf32>
      %108 = arith.divf %106, %107 : vector<2x40xf32>
      %109 = vector.extract_strided_slice %108 {offsets = [0, 0], sizes = [2, 20], strides = [1, 1]} : vector<2x40xf32> to vector<2x20xf32>
      %110 = vector.extract_strided_slice %108 {offsets = [0, 20], sizes = [2, 20], strides = [1, 1]} : vector<2x40xf32> to vector<2x20xf32>
      %111 = vector.extract_strided_slice %97 {offsets = [0, 40], sizes = [2, 20], strides = [1, 1]} : vector<2x60xf32> to vector<2x20xf32>
      %112 = vector.extract_strided_slice %100 {offsets = [0, 40], sizes = [2, 20], strides = [1, 1]} : vector<2x60xf32> to vector<2x20xf32>
      %113 = arith.mulf %109, %112 : vector<2x20xf32>
      %114 = arith.addf %111, %113 : vector<2x20xf32>
      %115 = math.tanh %114 : vector<2x20xf32>
      %cst_52 = arith.constant 1.000000e+00 : f32
      %116 = vector.broadcast %cst_52 : f32 to vector<2x20xf32>
      %117 = arith.subf %116, %110 : vector<2x20xf32>
      %118 = arith.mulf %117, %115 : vector<2x20xf32>
      %119 = arith.mulf %110, %80 : vector<2x20xf32>
      %120 = arith.addf %118, %119 : vector<2x20xf32>
      %121 = vector.extract_strided_slice %120 {offsets = [0, 0], sizes = [2, 10], strides = [1, 1]} : vector<2x20xf32> to vector<2x10xf32>
      %122 = arith.index_cast %arg9 : i32 to index
      %123 = arith.index_cast %c1_i32_46 : i32 to index
      %c0_53 = arith.constant 0 : index
      %c0_54 = arith.constant 0 : index
      %124 = vector.load %arg7[%122, %123, %c0_53, %c0_54] : memref<4x6x2x10xf32, #tpu.memory_space<vmem>>, vector<1x1x2x10xf32>
      %125 = vector.shape_cast %124 : vector<1x1x2x10xf32> to vector<2x10xf32>
      %126 = vector.shape_cast %121 : vector<2x10xf32> to vector<1x1x2x10xf32>
      tpu.vector_store %arg7[%122, %123, %c0_53, %c0_54], %126 {strides = array<i32>} : memref<4x6x2x10xf32, #tpu.memory_space<vmem>>, vector<1x1x2x10xf32>,
      %127 = vector.extract_strided_slice %120 {offsets = [0, 10], sizes = [2, 10], strides = [1, 1]} : vector<2x20xf32> to vector<2x10xf32>
      %128 = arith.index_cast %arg9 : i32 to index
      %129 = arith.index_cast %93 : i32 to index
      %c0_55 = arith.constant 0 : index
      %c0_56 = arith.constant 0 : index
      %130 = vector.load %arg8[%128, %129, %c0_55, %c0_56] : memref<4x6x2x10xf32, #tpu.memory_space<vmem>>, vector<1x1x2x10xf32>
      %131 = vector.shape_cast %130 : vector<1x1x2x10xf32> to vector<2x10xf32>
      %132 = vector.shape_cast %127 : vector<2x10xf32> to vector<1x1x2x10xf32>
      tpu.vector_store %arg8[%128, %129, %c0_55, %c0_56], %132 {strides = array<i32>} : memref<4x6x2x10xf32, #tpu.memory_space<vmem>>, vector<1x1x2x10xf32>,
      %c2_i32 = arith.constant 2 : i32
      %c5_i32_57 = arith.constant 5 : i32
      %133 = arith.subi %c5_i32_57, %c2_i32 : i32
      %134 = arith.index_cast %arg9 : i32 to index
      %135 = arith.index_cast %c2_i32 : i32 to index
      %c0_58 = arith.constant 0 : index
      %c0_59 = arith.constant 0 : index
      %136 = vector.load %arg0[%134, %135, %c0_58, %c0_59] : memref<4x6x2x60xf32, #tpu.memory_space<vmem>>, vector<1x1x2x60xf32>
      %137 = vector.shape_cast %136 : vector<1x1x2x60xf32> to vector<2x60xf32>
      %cst_60 = arith.constant dense<0.000000e+00> : vector<2x60xf32>
      %138 = tpu.matmul %120, %0, %cst_60 {dimension_numbers = #tpu.dot_dimension_numbers<[1], [0], [0], [1], [0, 0, 1, 1], [], []>} : vector<2x20xf32>, vector<20x60xf32>, vector<2x60xf32> -> vector<2x60xf32>
      %139 = vector.broadcast %1 : vector<1x60xf32> to vector<2x60xf32>
      %140 = arith.addf %138, %139 : vector<2x60xf32>
      %141 = vector.extract_strided_slice %137 {offsets = [0, 0], sizes = [2, 40], strides = [1, 1]} : vector<2x60xf32> to vector<2x40xf32>
      %142 = vector.extract_strided_slice %140 {offsets = [0, 0], sizes = [2, 40], strides = [1, 1]} : vector<2x60xf32> to vector<2x40xf32>
      %143 = arith.addf %141, %142 : vector<2x40xf32>
      %144 = arith.negf %143 : vector<2x40xf32>
      %145 = math.exp %144 : vector<2x40xf32>
      %cst_61 = arith.constant 1.000000e+00 : f32
      %146 = vector.broadcast %cst_61 : f32 to vector<2x40xf32>
      %147 = arith.addf %146, %145 : vector<2x40xf32>
      %148 = arith.divf %146, %147 : vector<2x40xf32>
      %149 = vector.extract_strided_slice %148 {offsets = [0, 0], sizes = [2, 20], strides = [1, 1]} : vector<2x40xf32> to vector<2x20xf32>
      %150 = vector.extract_strided_slice %148 {offsets = [0, 20], sizes = [2, 20], strides = [1, 1]} : vector<2x40xf32> to vector<2x20xf32>
      %151 = vector.extract_strided_slice %137 {offsets = [0, 40], sizes = [2, 20], strides = [1, 1]} : vector<2x60xf32> to vector<2x20xf32>
      %152 = vector.extract_strided_slice %140 {offsets = [0, 40], sizes = [2, 20], strides = [1, 1]} : vector<2x60xf32> to vector<2x20xf32>
      %153 = arith.mulf %149, %152 : vector<2x20xf32>
      %154 = arith.addf %151, %153 : vector<2x20xf32>
      %155 = math.tanh %154 : vector<2x20xf32>
      %cst_62 = arith.constant 1.000000e+00 : f32
      %156 = vector.broadcast %cst_62 : f32 to vector<2x20xf32>
      %157 = arith.subf %156, %150 : vector<2x20xf32>
      %158 = arith.mulf %157, %155 : vector<2x20xf32>
      %159 = arith.mulf %150, %120 : vector<2x20xf32>
      %160 = arith.addf %158, %159 : vector<2x20xf32>
      %161 = vector.extract_strided_slice %160 {offsets = [0, 0], sizes = [2, 10], strides = [1, 1]} : vector<2x20xf32> to vector<2x10xf32>
      %162 = arith.index_cast %arg9 : i32 to index
      %163 = arith.index_cast %c2_i32 : i32 to index
      %c0_63 = arith.constant 0 : index
      %c0_64 = arith.constant 0 : index
      %164 = vector.load %arg7[%162, %163, %c0_63, %c0_64] : memref<4x6x2x10xf32, #tpu.memory_space<vmem>>, vector<1x1x2x10xf32>
      %165 = vector.shape_cast %164 : vector<1x1x2x10xf32> to vector<2x10xf32>
      %166 = vector.shape_cast %161 : vector<2x10xf32> to vector<1x1x2x10xf32>
      tpu.vector_store %arg7[%162, %163, %c0_63, %c0_64], %166 {strides = array<i32>} : memref<4x6x2x10xf32, #tpu.memory_space<vmem>>, vector<1x1x2x10xf32>,
      %167 = vector.extract_strided_slice %160 {offsets = [0, 10], sizes = [2, 10], strides = [1, 1]} : vector<2x20xf32> to vector<2x10xf32>
      %168 = arith.index_cast %arg9 : i32 to index
      %169 = arith.index_cast %133 : i32 to index
      %c0_65 = arith.constant 0 : index
      %c0_66 = arith.constant 0 : index
      %170 = vector.load %arg8[%168, %169, %c0_65, %c0_66] : memref<4x6x2x10xf32, #tpu.memory_space<vmem>>, vector<1x1x2x10xf32>
      %171 = vector.shape_cast %170 : vector<1x1x2x10xf32> to vector<2x10xf32>
      %172 = vector.shape_cast %167 : vector<2x10xf32> to vector<1x1x2x10xf32>
      tpu.vector_store %arg8[%168, %169, %c0_65, %c0_66], %172 {strides = array<i32>} : memref<4x6x2x10xf32, #tpu.memory_space<vmem>>, vector<1x1x2x10xf32>,
      %c3_i32 = arith.constant 3 : i32
      %c5_i32_67 = arith.constant 5 : i32
      %173 = arith.subi %c5_i32_67, %c3_i32 : i32
      %174 = arith.index_cast %arg9 : i32 to index
      %175 = arith.index_cast %c3_i32 : i32 to index
      %c0_68 = arith.constant 0 : index
      %c0_69 = arith.constant 0 : index
      %176 = vector.load %arg0[%174, %175, %c0_68, %c0_69] : memref<4x6x2x60xf32, #tpu.memory_space<vmem>>, vector<1x1x2x60xf32>
      %177 = vector.shape_cast %176 : vector<1x1x2x60xf32> to vector<2x60xf32>
      %cst_70 = arith.constant dense<0.000000e+00> : vector<2x60xf32>
      %178 = tpu.matmul %160, %0, %cst_70 {dimension_numbers = #tpu.dot_dimension_numbers<[1], [0], [0], [1], [0, 0, 1, 1], [], []>} : vector<2x20xf32>, vector<20x60xf32>, vector<2x60xf32> -> vector<2x60xf32>
      %179 = vector.broadcast %1 : vector<1x60xf32> to vector<2x60xf32>
      %180 = arith.addf %178, %179 : vector<2x60xf32>
      %181 = vector.extract_strided_slice %177 {offsets = [0, 0], sizes = [2, 40], strides = [1, 1]} : vector<2x60xf32> to vector<2x40xf32>
      %182 = vector.extract_strided_slice %180 {offsets = [0, 0], sizes = [2, 40], strides = [1, 1]} : vector<2x60xf32> to vector<2x40xf32>
      %183 = arith.addf %181, %182 : vector<2x40xf32>
      %184 = arith.negf %183 : vector<2x40xf32>
      %185 = math.exp %184 : vector<2x40xf32>
      %cst_71 = arith.constant 1.000000e+00 : f32
      %186 = vector.broadcast %cst_71 : f32 to vector<2x40xf32>
      %187 = arith.addf %186, %185 : vector<2x40xf32>
      %188 = arith.divf %186, %187 : vector<2x40xf32>
      %189 = vector.extract_strided_slice %188 {offsets = [0, 0], sizes = [2, 20], strides = [1, 1]} : vector<2x40xf32> to vector<2x20xf32>
      %190 = vector.extract_strided_slice %188 {offsets = [0, 20], sizes = [2, 20], strides = [1, 1]} : vector<2x40xf32> to vector<2x20xf32>
      %191 = vector.extract_strided_slice %177 {offsets = [0, 40], sizes = [2, 20], strides = [1, 1]} : vector<2x60xf32> to vector<2x20xf32>
      %192 = vector.extract_strided_slice %180 {offsets = [0, 40], sizes = [2, 20], strides = [1, 1]} : vector<2x60xf32> to vector<2x20xf32>
      %193 = arith.mulf %189, %192 : vector<2x20xf32>
      %194 = arith.addf %191, %193 : vector<2x20xf32>
      %195 = math.tanh %194 : vector<2x20xf32>
      %cst_72 = arith.constant 1.000000e+00 : f32
      %196 = vector.broadcast %cst_72 : f32 to vector<2x20xf32>
      %197 = arith.subf %196, %190 : vector<2x20xf32>
      %198 = arith.mulf %197, %195 : vector<2x20xf32>
      %199 = arith.mulf %190, %160 : vector<2x20xf32>
      %200 = arith.addf %198, %199 : vector<2x20xf32>
      %201 = vector.extract_strided_slice %200 {offsets = [0, 0], sizes = [2, 10], strides = [1, 1]} : vector<2x20xf32> to vector<2x10xf32>
      %202 = arith.index_cast %arg9 : i32 to index
      %203 = arith.index_cast %c3_i32 : i32 to index
      %c0_73 = arith.constant 0 : index
      %c0_74 = arith.constant 0 : index
      %204 = vector.load %arg7[%202, %203, %c0_73, %c0_74] : memref<4x6x2x10xf32, #tpu.memory_space<vmem>>, vector<1x1x2x10xf32>
      %205 = vector.shape_cast %204 : vector<1x1x2x10xf32> to vector<2x10xf32>
      %206 = vector.shape_cast %201 : vector<2x10xf32> to vector<1x1x2x10xf32>
      tpu.vector_store %arg7[%202, %203, %c0_73, %c0_74], %206 {strides = array<i32>} : memref<4x6x2x10xf32, #tpu.memory_space<vmem>>, vector<1x1x2x10xf32>,
      %207 = vector.extract_strided_slice %200 {offsets = [0, 10], sizes = [2, 10], strides = [1, 1]} : vector<2x20xf32> to vector<2x10xf32>
      %208 = arith.index_cast %arg9 : i32 to index
      %209 = arith.index_cast %173 : i32 to index
      %c0_75 = arith.constant 0 : index
      %c0_76 = arith.constant 0 : index
      %210 = vector.load %arg8[%208, %209, %c0_75, %c0_76] : memref<4x6x2x10xf32, #tpu.memory_space<vmem>>, vector<1x1x2x10xf32>
      %211 = vector.shape_cast %210 : vector<1x1x2x10xf32> to vector<2x10xf32>
      %212 = vector.shape_cast %207 : vector<2x10xf32> to vector<1x1x2x10xf32>
      tpu.vector_store %arg8[%208, %209, %c0_75, %c0_76], %212 {strides = array<i32>} : memref<4x6x2x10xf32, #tpu.memory_space<vmem>>, vector<1x1x2x10xf32>,
      %c4_i32_77 = arith.constant 4 : i32
      %c5_i32_78 = arith.constant 5 : i32
      %213 = arith.subi %c5_i32_78, %c4_i32_77 : i32
      %214 = arith.index_cast %arg9 : i32 to index
      %215 = arith.index_cast %c4_i32_77 : i32 to index
      %c0_79 = arith.constant 0 : index
      %c0_80 = arith.constant 0 : index
      %216 = vector.load %arg0[%214, %215, %c0_79, %c0_80] : memref<4x6x2x60xf32, #tpu.memory_space<vmem>>, vector<1x1x2x60xf32>
      %217 = vector.shape_cast %216 : vector<1x1x2x60xf32> to vector<2x60xf32>
      %cst_81 = arith.constant dense<0.000000e+00> : vector<2x60xf32>
      %218 = tpu.matmul %200, %0, %cst_81 {dimension_numbers = #tpu.dot_dimension_numbers<[1], [0], [0], [1], [0, 0, 1, 1], [], []>} : vector<2x20xf32>, vector<20x60xf32>, vector<2x60xf32> -> vector<2x60xf32>
      %219 = vector.broadcast %1 : vector<1x60xf32> to vector<2x60xf32>
      %220 = arith.addf %218, %219 : vector<2x60xf32>
      %221 = vector.extract_strided_slice %217 {offsets = [0, 0], sizes = [2, 40], strides = [1, 1]} : vector<2x60xf32> to vector<2x40xf32>
      %222 = vector.extract_strided_slice %220 {offsets = [0, 0], sizes = [2, 40], strides = [1, 1]} : vector<2x60xf32> to vector<2x40xf32>
      %223 = arith.addf %221, %222 : vector<2x40xf32>
      %224 = arith.negf %223 : vector<2x40xf32>
      %225 = math.exp %224 : vector<2x40xf32>
      %cst_82 = arith.constant 1.000000e+00 : f32
      %226 = vector.broadcast %cst_82 : f32 to vector<2x40xf32>
      %227 = arith.addf %226, %225 : vector<2x40xf32>
      %228 = arith.divf %226, %227 : vector<2x40xf32>
      %229 = vector.extract_strided_slice %228 {offsets = [0, 0], sizes = [2, 20], strides = [1, 1]} : vector<2x40xf32> to vector<2x20xf32>
      %230 = vector.extract_strided_slice %228 {offsets = [0, 20], sizes = [2, 20], strides = [1, 1]} : vector<2x40xf32> to vector<2x20xf32>
      %231 = vector.extract_strided_slice %217 {offsets = [0, 40], sizes = [2, 20], strides = [1, 1]} : vector<2x60xf32> to vector<2x20xf32>
      %232 = vector.extract_strided_slice %220 {offsets = [0, 40], sizes = [2, 20], strides = [1, 1]} : vector<2x60xf32> to vector<2x20xf32>
      %233 = arith.mulf %229, %232 : vector<2x20xf32>
      %234 = arith.addf %231, %233 : vector<2x20xf32>
      %235 = math.tanh %234 : vector<2x20xf32>
      %cst_83 = arith.constant 1.000000e+00 : f32
      %236 = vector.broadcast %cst_83 : f32 to vector<2x20xf32>
      %237 = arith.subf %236, %230 : vector<2x20xf32>
      %238 = arith.mulf %237, %235 : vector<2x20xf32>
      %239 = arith.mulf %230, %200 : vector<2x20xf32>
      %240 = arith.addf %238, %239 : vector<2x20xf32>
      %241 = vector.extract_strided_slice %240 {offsets = [0, 0], sizes = [2, 10], strides = [1, 1]} : vector<2x20xf32> to vector<2x10xf32>
      %242 = arith.index_cast %arg9 : i32 to index
      %243 = arith.index_cast %c4_i32_77 : i32 to index
      %c0_84 = arith.constant 0 : index
      %c0_85 = arith.constant 0 : index
      %244 = vector.load %arg7[%242, %243, %c0_84, %c0_85] : memref<4x6x2x10xf32, #tpu.memory_space<vmem>>, vector<1x1x2x10xf32>
      %245 = vector.shape_cast %244 : vector<1x1x2x10xf32> to vector<2x10xf32>
      %246 = vector.shape_cast %241 : vector<2x10xf32> to vector<1x1x2x10xf32>
      tpu.vector_store %arg7[%242, %243, %c0_84, %c0_85], %246 {strides = array<i32>} : memref<4x6x2x10xf32, #tpu.memory_space<vmem>>, vector<1x1x2x10xf32>,
      %247 = vector.extract_strided_slice %240 {offsets = [0, 10], sizes = [2, 10], strides = [1, 1]} : vector<2x20xf32> to vector<2x10xf32>
      %248 = arith.index_cast %arg9 : i32 to index
      %249 = arith.index_cast %213 : i32 to index
      %c0_86 = arith.constant 0 : index
      %c0_87 = arith.constant 0 : index
      %250 = vector.load %arg8[%248, %249, %c0_86, %c0_87] : memref<4x6x2x10xf32, #tpu.memory_space<vmem>>, vector<1x1x2x10xf32>
      %251 = vector.shape_cast %250 : vector<1x1x2x10xf32> to vector<2x10xf32>
      %252 = vector.shape_cast %247 : vector<2x10xf32> to vector<1x1x2x10xf32>
      tpu.vector_store %arg8[%248, %249, %c0_86, %c0_87], %252 {strides = array<i32>} : memref<4x6x2x10xf32, #tpu.memory_space<vmem>>, vector<1x1x2x10xf32>,
      %c5_i32_88 = arith.constant 5 : i32
      %c5_i32_89 = arith.constant 5 : i32
      %253 = arith.subi %c5_i32_89, %c5_i32_88 : i32
      %254 = arith.index_cast %arg9 : i32 to index
      %255 = arith.index_cast %c5_i32_88 : i32 to index
      %c0_90 = arith.constant 0 : index
      %c0_91 = arith.constant 0 : index
      %256 = vector.load %arg0[%254, %255, %c0_90, %c0_91] : memref<4x6x2x60xf32, #tpu.memory_space<vmem>>, vector<1x1x2x60xf32>
      %257 = vector.shape_cast %256 : vector<1x1x2x60xf32> to vector<2x60xf32>
      %cst_92 = arith.constant dense<0.000000e+00> : vector<2x60xf32>
      %258 = tpu.matmul %240, %0, %cst_92 {dimension_numbers = #tpu.dot_dimension_numbers<[1], [0], [0], [1], [0, 0, 1, 1], [], []>} : vector<2x20xf32>, vector<20x60xf32>, vector<2x60xf32> -> vector<2x60xf32>
      %259 = vector.broadcast %1 : vector<1x60xf32> to vector<2x60xf32>
      %260 = arith.addf %258, %259 : vector<2x60xf32>
      %261 = vector.extract_strided_slice %257 {offsets = [0, 0], sizes = [2, 40], strides = [1, 1]} : vector<2x60xf32> to vector<2x40xf32>
      %262 = vector.extract_strided_slice %260 {offsets = [0, 0], sizes = [2, 40], strides = [1, 1]} : vector<2x60xf32> to vector<2x40xf32>
      %263 = arith.addf %261, %262 : vector<2x40xf32>
      %264 = arith.negf %263 : vector<2x40xf32>
      %265 = math.exp %264 : vector<2x40xf32>
      %cst_93 = arith.constant 1.000000e+00 : f32
      %266 = vector.broadcast %cst_93 : f32 to vector<2x40xf32>
      %267 = arith.addf %266, %265 : vector<2x40xf32>
      %268 = arith.divf %266, %267 : vector<2x40xf32>
      %269 = vector.extract_strided_slice %268 {offsets = [0, 0], sizes = [2, 20], strides = [1, 1]} : vector<2x40xf32> to vector<2x20xf32>
      %270 = vector.extract_strided_slice %268 {offsets = [0, 20], sizes = [2, 20], strides = [1, 1]} : vector<2x40xf32> to vector<2x20xf32>
      %271 = vector.extract_strided_slice %257 {offsets = [0, 40], sizes = [2, 20], strides = [1, 1]} : vector<2x60xf32> to vector<2x20xf32>
      %272 = vector.extract_strided_slice %260 {offsets = [0, 40], sizes = [2, 20], strides = [1, 1]} : vector<2x60xf32> to vector<2x20xf32>
      %273 = arith.mulf %269, %272 : vector<2x20xf32>
      %274 = arith.addf %271, %273 : vector<2x20xf32>
      %275 = math.tanh %274 : vector<2x20xf32>
      %cst_94 = arith.constant 1.000000e+00 : f32
      %276 = vector.broadcast %cst_94 : f32 to vector<2x20xf32>
      %277 = arith.subf %276, %270 : vector<2x20xf32>
      %278 = arith.mulf %277, %275 : vector<2x20xf32>
      %279 = arith.mulf %270, %240 : vector<2x20xf32>
      %280 = arith.addf %278, %279 : vector<2x20xf32>
      %281 = vector.extract_strided_slice %280 {offsets = [0, 0], sizes = [2, 10], strides = [1, 1]} : vector<2x20xf32> to vector<2x10xf32>
      %282 = arith.index_cast %arg9 : i32 to index
      %283 = arith.index_cast %c5_i32_88 : i32 to index
      %c0_95 = arith.constant 0 : index
      %c0_96 = arith.constant 0 : index
      %284 = vector.load %arg7[%282, %283, %c0_95, %c0_96] : memref<4x6x2x10xf32, #tpu.memory_space<vmem>>, vector<1x1x2x10xf32>
      %285 = vector.shape_cast %284 : vector<1x1x2x10xf32> to vector<2x10xf32>
      %286 = vector.shape_cast %281 : vector<2x10xf32> to vector<1x1x2x10xf32>
      tpu.vector_store %arg7[%282, %283, %c0_95, %c0_96], %286 {strides = array<i32>} : memref<4x6x2x10xf32, #tpu.memory_space<vmem>>, vector<1x1x2x10xf32>,
      %287 = vector.extract_strided_slice %280 {offsets = [0, 10], sizes = [2, 10], strides = [1, 1]} : vector<2x20xf32> to vector<2x10xf32>
      %288 = arith.index_cast %arg9 : i32 to index
      %289 = arith.index_cast %253 : i32 to index
      %c0_97 = arith.constant 0 : index
      %c0_98 = arith.constant 0 : index
      %290 = vector.load %arg8[%288, %289, %c0_97, %c0_98] : memref<4x6x2x10xf32, #tpu.memory_space<vmem>>, vector<1x1x2x10xf32>
      %291 = vector.shape_cast %290 : vector<1x1x2x10xf32> to vector<2x10xf32>
      %292 = vector.shape_cast %287 : vector<2x10xf32> to vector<1x1x2x10xf32>
      tpu.vector_store %arg8[%288, %289, %c0_97, %c0_98], %292 {strides = array<i32>} : memref<4x6x2x10xf32, #tpu.memory_space<vmem>>, vector<1x1x2x10xf32>,
      %c6_i32 = arith.constant 6 : i32
      scf.yield %280 : vector<2x20xf32>
    }
    %c4_i32_3 = arith.constant 4 : i32
    %c0_4 = arith.constant 0 : index
    %c0_5 = arith.constant 0 : index
    %c0_6 = arith.constant 0 : index
    %c0_7 = arith.constant 0 : index
    %5 = vector.load %arg7[%c0_4, %c0_5, %c0_6, %c0_7] : memref<4x6x2x10xf32, #tpu.memory_space<vmem>>, vector<4x6x2x10xf32>
    %c0_8 = arith.constant 0 : index
    %c0_9 = arith.constant 0 : index
    %c0_10 = arith.constant 0 : index
    %c0_11 = arith.constant 0 : index
    %6 = vector.load %arg8[%c0_8, %c0_9, %c0_10, %c0_11] : memref<4x6x2x10xf32, #tpu.memory_space<vmem>>, vector<4x6x2x10xf32>
    %7 = vector.shape_cast %5 : vector<4x6x2x10xf32> to vector<24x2x10xf32>
    %8 = vector.shape_cast %6 : vector<4x6x2x10xf32> to vector<24x2x10xf32>
    %c0_12 = arith.constant 0 : index
    %c0_13 = arith.constant 0 : index
    %c0_14 = arith.constant 0 : index
    %9 = vector.load %arg3[%c0_12, %c0_13, %c0_14] : memref<2x20x10xf32, #tpu.memory_space<vmem>>, vector<1x20x10xf32>
    %10 = vector.shape_cast %9 : vector<1x20x10xf32> to vector<20x10xf32>
    %11 = vector.shape_cast %10 : vector<20x10xf32> to vector<1x20x10xf32>
    %12 = vector.broadcast %11 : vector<1x20x10xf32> to vector<24x20x10xf32>
    %c1 = arith.constant 1 : index
    %c0_15 = arith.constant 0 : index
    %c0_16 = arith.constant 0 : index
    %13 = vector.load %arg3[%c1, %c0_15, %c0_16] : memref<2x20x10xf32, #tpu.memory_space<vmem>>, vector<1x20x10xf32>
    %14 = vector.shape_cast %13 : vector<1x20x10xf32> to vector<20x10xf32>
    %15 = vector.shape_cast %14 : vector<20x10xf32> to vector<1x20x10xf32>
    %16 = vector.broadcast %15 : vector<1x20x10xf32> to vector<24x20x10xf32>
    "tpu.trace_start"() <{level = 10 : i32, message = "nbj,nkj->nbk"}> : () -> ()
    %cst_17 = arith.constant dense<0.000000e+00> : vector<24x2x20xf32>
    %17 = tpu.matmul %7, %12, %cst_17 {dimension_numbers = #tpu.dot_dimension_numbers<[2], [2], [1], [1], [0, 0, 0, 1, 1, 1], [0], [0]>} : vector<24x2x10xf32>, vector<24x20x10xf32>, vector<24x2x20xf32> -> vector<24x2x20xf32>
    %cst_18 = arith.constant dense<0.000000e+00> : vector<24x2x20xf32>
    %18 = tpu.matmul %8, %16, %cst_18 {dimension_numbers = #tpu.dot_dimension_numbers<[2], [2], [1], [1], [0, 0, 0, 1, 1, 1], [0], [0]>} : vector<24x2x10xf32>, vector<24x20x10xf32>, vector<24x2x20xf32> -> vector<24x2x20xf32>
    "tpu.trace_stop"() : () -> ()
    %19 = arith.addf %17, %18 : vector<24x2x20xf32>
    %c0_19 = arith.constant 0 : index
    %c0_20 = arith.constant 0 : index
    %20 = vector.load %arg4[%c0_19, %c0_20] : memref<1x20xf32, #tpu.memory_space<vmem>>, vector<1x20xf32>
    %21 = vector.shape_cast %20 : vector<1x20xf32> to vector<1x1x20xf32>
    %22 = vector.broadcast %21 : vector<1x1x20xf32> to vector<24x2x20xf32>
    %23 = arith.addf %19, %22 : vector<24x2x20xf32>
    %24 = math.tanh %23 : vector<24x2x20xf32>
    %c0_21 = arith.constant 0 : index
    %c0_22 = arith.constant 0 : index
    %25 = vector.load %arg5[%c0_21, %c0_22] : memref<1x20xf32, #tpu.memory_space<vmem>>, vector<1x20xf32>
    %26 = vector.shape_cast %25 : vector<1x20xf32> to vector<1x1x20xf32>
    %27 = vector.broadcast %26 : vector<1x1x20xf32> to vector<24x2x20xf32>
    %28 = arith.mulf %24, %27 : vector<24x2x20xf32>
    %cst_23 = arith.constant dense<0.000000e+00> : vector<24x2xf32>
    %29 = vector.multi_reduction <add>, %28, %cst_23 [2] : vector<24x2x20xf32> to vector<24x2xf32>
    %30 = vector.shape_cast %29 : vector<24x2xf32> to vector<24x2x1xf32>
    %31 = vector.shape_cast %30 : vector<24x2x1xf32> to vector<4x6x2x1xf32>
    %cst_24 = arith.constant dense<0xFF800000> : vector<6x2x1xf32>
    %32 = vector.multi_reduction <maximumf>, %31, %cst_24 [0] : vector<4x6x2x1xf32> to vector<6x2x1xf32>
    %33 = vector.shape_cast %32 : vector<6x2x1xf32> to vector<1x6x2x1xf32>
    %34 = vector.broadcast %33 : vector<1x6x2x1xf32> to vector<4x6x2x1xf32>
    %35 = arith.subf %31, %34 : vector<4x6x2x1xf32>
    %36 = math.exp %35 : vector<4x6x2x1xf32>
    %cst_25 = arith.constant dense<0.000000e+00> : vector<6x2x1xf32>
    %37 = vector.multi_reduction <add>, %36, %cst_25 [0] : vector<4x6x2x1xf32> to vector<6x2x1xf32>
    %38 = vector.shape_cast %37 : vector<6x2x1xf32> to vector<1x6x2x1xf32>
    %39 = vector.broadcast %38 : vector<1x6x2x1xf32> to vector<4x6x2x1xf32>
    %40 = arith.divf %36, %39 : vector<4x6x2x1xf32>
    %41 = vector.broadcast %40 : vector<4x6x2x1xf32> to vector<4x6x2x10xf32>
    %42 = arith.mulf %41, %5 : vector<4x6x2x10xf32>
    %cst_26 = arith.constant dense<0.000000e+00> : vector<6x2x10xf32>
    %43 = vector.multi_reduction <add>, %42, %cst_26 [0] : vector<4x6x2x10xf32> to vector<6x2x10xf32>
    %c0_27 = arith.constant 0 : index
    %c0_28 = arith.constant 0 : index
    %c0_29 = arith.constant 0 : index
    %c0_30 = arith.constant 0 : index
    %44 = vector.load %arg6[%c0_27, %c0_28, %c0_29, %c0_30] : memref<2x6x2x10xf32, #tpu.memory_space<vmem>>, vector<1x6x2x10xf32>
    %45 = vector.shape_cast %44 : vector<1x6x2x10xf32> to vector<6x2x10xf32>
    %46 = vector.shape_cast %43 : vector<6x2x10xf32> to vector<1x6x2x10xf32>
    tpu.vector_store %arg6[%c0_27, %c0_28, %c0_29, %c0_30], %46 {strides = array<i32>} : memref<2x6x2x10xf32, #tpu.memory_space<vmem>>, vector<1x6x2x10xf32>,
    %47 = vector.broadcast %40 : vector<4x6x2x1xf32> to vector<4x6x2x10xf32>
    %48 = arith.mulf %47, %6 : vector<4x6x2x10xf32>
    %cst_31 = arith.constant dense<0.000000e+00> : vector<6x2x10xf32>
    %49 = vector.multi_reduction <add>, %48, %cst_31 [0] : vector<4x6x2x10xf32> to vector<6x2x10xf32>
    %c1_32 = arith.constant 1 : index
    %c0_33 = arith.constant 0 : index
    %c0_34 = arith.constant 0 : index
    %c0_35 = arith.constant 0 : index
    %50 = vector.load %arg6[%c1_32, %c0_33, %c0_34, %c0_35] : memref<2x6x2x10xf32, #tpu.memory_space<vmem>>, vector<1x6x2x10xf32>
    %51 = vector.shape_cast %50 : vector<1x6x2x10xf32> to vector<6x2x10xf32>
    %52 = vector.shape_cast %49 : vector<6x2x10xf32> to vector<1x6x2x10xf32>
    tpu.vector_store %arg6[%c1_32, %c0_33, %c0_34, %c0_35], %52 {strides = array<i32>} : memref<2x6x2x10xf32, #tpu.memory_space<vmem>>, vector<1x6x2x10xf32>,
    return
  }
}

</mosaic_0001>

<bundles_post_ra>
// kernel: reverse
= control target key start
LH: loop header
LB: loop body
LE: loop exit
PB: predicated region body
PF: predicated region fallthrough
CT: control target
= control target key end

     0   :  { %s296_s0 = inlined_call_operand.vmem [shape: f32[4,6,2,10], index: 0, kind: input, shape index: {}]   ;;  %s297_s1 = inlined_call_operand.vmem [shape: f32[4,6,2,10], index: 1, kind: output, shape index: {}]  }
   0x1   :  { %v96_v0 = vld [vmem:[%s296_s0 + $0xa] sm:$0x3]  ;;  %v97_v1 = vld [vmem:[%s296_s0 + $0x16] sm:$0x3]  ;;  %v99_v2 = vld [vmem:[%s296_s0 + $0x22] sm:$0x3] }
   0x2   :  { %4 = vst [vmem:[%s297_s1] sm:$0x3] %v96_v0  ;;  %v101_v3 = vld [vmem:[%s296_s0 + $0x2e] sm:$0x3]  ;;  %v103_v4 = vld [vmem:[%s296_s0 + $0x8] sm:$0x3] }
   0x3   :  { %98 = vst [vmem:[%s297_s1 + $0xc] sm:$0x3] %v97_v1  ;;  %v105_v5 = vld [vmem:[%s296_s0 + $0x14] sm:$0x3]  ;;  %v107_v6 = vld [vmem:[%s296_s0 + $0x20] sm:$0x3] }
   0x4   :  { %100 = vst [vmem:[%s297_s1 + $0x18] sm:$0x3] %v99_v2  ;;  %v109_v7 = vld [vmem:[%s296_s0 + $0x2c] sm:$0x3]  ;;  %v111_v8 = vld [vmem:[%s296_s0 + $0x6] sm:$0x3] }
   0x5   :  { %102 = vst [vmem:[%s297_s1 + $0x24] sm:$0x3] %v101_v3  ;;  %v113_v9 = vld [vmem:[%s296_s0 + $0x12] sm:$0x3]  ;;  %v115_v10 = vld [vmem:[%s296_s0 + $0x1e] sm:$0x3] }
   0x6   :  { %104 = vst [vmem:[%s297_s1 + $0x2] sm:$0x3] %v103_v4  ;;  %v117_v11 = vld [vmem:[%s296_s0 + $0x2a] sm:$0x3]  ;;  %v119_v12 = vld [vmem:[%s296_s0 + $0x4] sm:$0x3] }
   0x7   :  { %106 = vst [vmem:[%s297_s1 + $0xe] sm:$0x3] %v105_v5  ;;  %v121_v13 = vld [vmem:[%s296_s0 + $0x10] sm:$0x3]  ;;  %v123_v14 = vld [vmem:[%s296_s0 + $0x1c] sm:$0x3] }
   0x8   :  { %108 = vst [vmem:[%s297_s1 + $0x1a] sm:$0x3] %v107_v6  ;;  %v125_v15 = vld [vmem:[%s296_s0 + $0x28] sm:$0x3]  ;;  %v127_v16 = vld [vmem:[%s296_s0 + $0x2] sm:$0x3] }
   0x9   :  { %110 = vst [vmem:[%s297_s1 + $0x26] sm:$0x3] %v109_v7  ;;  %v129_v17 = vld [vmem:[%s296_s0 + $0xe] sm:$0x3]  ;;  %v131_v18 = vld [vmem:[%s296_s0 + $0x1a] sm:$0x3] }
   0xa   :  { %112 = vst [vmem:[%s297_s1 + $0x4] sm:$0x3] %v111_v8  ;;  %v133_v19 = vld [vmem:[%s296_s0 + $0x26] sm:$0x3]  ;;  %v81_v20 = vld [vmem:[%s296_s0] sm:$0x3] }
   0xb   :  { %114 = vst [vmem:[%s297_s1 + $0x10] sm:$0x3] %v113_v9  ;;  %v136_v21 = vld [vmem:[%s296_s0 + $0xc] sm:$0x3]  ;;  %v138_v22 = vld [vmem:[%s296_s0 + $0x18] sm:$0x3] }
   0xc   :  { %116 = vst [vmem:[%s297_s1 + $0x1c] sm:$0x3] %v115_v10  ;;  %v140_v23 = vld [vmem:[%s296_s0 + $0x24] sm:$0x3] }
   0xd   :  { %118 = vst [vmem:[%s297_s1 + $0x28] sm:$0x3] %v117_v11 }
   0xe   :  { %120 = vst [vmem:[%s297_s1 + $0x6] sm:$0x3] %v119_v12 }
   0xf   :  { %122 = vst [vmem:[%s297_s1 + $0x12] sm:$0x3] %v121_v13 }
  0x10   :  { %124 = vst [vmem:[%s297_s1 + $0x1e] sm:$0x3] %v123_v14 }
  0x11   :  { %126 = vst [vmem:[%s297_s1 + $0x2a] sm:$0x3] %v125_v15 }
  0x12   :  { %128 = vst [vmem:[%s297_s1 + $0x8] sm:$0x3] %v127_v16 }
  0x13   :  { %130 = vst [vmem:[%s297_s1 + $0x14] sm:$0x3] %v129_v17 }
  0x14   :  { %132 = vst [vmem:[%s297_s1 + $0x20] sm:$0x3] %v131_v18 }
  0x15   :  { %134 = vst [vmem:[%s297_s1 + $0x2c] sm:$0x3] %v133_v19 }
  0x16   :  { %135 = vst [vmem:[%s297_s1 + $0xa] sm:$0x3] %v81_v20 }
  0x17   :  { %137 = vst [vmem:[%s297_s1 + $0x16] sm:$0x3] %v136_v21 }
  0x18   :  { %139 = vst [vmem:[%s297_s1 + $0x22] sm:$0x3] %v138_v22 }
  0x19   :  { %141 = vst [vmem:[%s297_s1 + $0x2e] sm:$0x3] %v140_v23 }

// kernel: word_attention_forward.1
= control target key start
LH: loop header
LB: loop body
LE: loop exit
PB: predicated region body
PF: predicated region fallthrough
CT: control target
= control target key end

     0   :  { %v2821_v4 = vmov 0.0   ;;  %s2823_s29 = smov 0   ;;  %s3884_s0 = inlined_call_operand.vmem [shape: f32[4,6,2,60], index: 0, kind: input, shape index: {}]   ;;  %s3885_s1 = inlined_call_operand.vmem [shape: f32[20,60], index: 1, kind: input, shape index: {}]   ;;  %s3886_s2 = inlined_call_operand.vmem [shape: f32[1,60], index: 2, kind: input, shape index: {}]   ;;  %s3887_s3 = inlined_call_operand.vmem [shape: f32[2,20,10], index: 3, kind: input, shape index: {}]   ;;  %s3888_s4 = inlined_call_operand.vmem [shape: f32[1,20], index: 4, kind: input, shape index: {}]   ;;  %s3889_s5 = inlined_call_operand.vmem [shape: f32[1,20], index: 5, kind: input, shape index: {}]   ;;  %s3890_s6 = inlined_call_operand.vmem [shape: f32[2,6,2,10], index: 6, kind: output, shape index: {}]  }
   0x1   :  { %v2804_v0 = vld [vmem:[%s3885_s1] sm:$0xff]  ;;  %v2809_v1 = vld [vmem:[%s3885_s1 + $0x8] sm:$0xff]  ;;  %v2814_v2 = vld [vmem:[%s3885_s1 + $0x10] sm:$0xf] }
   0x2   :  { %v2819_v3 = vld [vmem:[%s3886_s2] sm:$0x1] }
   0x3 LB: > { %vm46_vm0 = vcmask 1043456   ;;  %s2762_s1 = smov 108   ;;  %vm43_vm1 = vcmask 162816   ;;  %v2853_v6 = vperm.slane %v2819_v3, 0  ;;  %s2763_s2 = smov 88   ;;  %vm114_vm6 = vcmask 74752   ;;  %s2760_s29 = sphi %s2823_s29, %s32_s29   ;;  %v2756_v4 = vphi %v2821_v4, %v484_v4  }
   0x4   : > { %2301 = vmatpush.msk.msra.mxu0 %vm46_vm0, %v2814_v2  ;;  %2306 = vmatpush.msk.msra.mxu1 %vm46_vm0, %v2814_v2  ;;  %s2858_s30 = smul.u32 12, %s2760_s29  ;;  %s2764_s10 = smov 40  }
   0x5   : > { %41 = vrot.lane.b32.xlu0 %v2756_v4, %s2762_s1  ;;  %2312 = vmatpush.msk.msra.mxu2 %vm46_vm0, %v2814_v2  ;;  %s2765_s12 = smov 98   ;;  %s32_s29 = sadd.s32 1, %s2760_s29  }
   0x6   : > { %64 = vmatpush.msra.mxu0 %v2809_v1  ;;  %141 = vmatpush.msra.mxu1 %v2809_v1  ;;  %s2864_s9 = scalar_lea.vmem %s3884_s0, %s2858_s30  ;;  %s2875_s11 = scalar_lea.vmem [#allocation2], %s2858_s30 }
   0x7   : > { %217 = vmatpush.msra.mxu2 %v2809_v1  ;;  %2318 = vmatpush.msk.msra.mxu3 %vm46_vm0, %v2814_v2  ;;  %v36_v9 = vld [vmem:[%s2864_s9] sm:$0x3]  ;;  %v2305_v37 = vld [vmem:[%s2864_s9 + $0x2] sm:$0x3]  ;;  %s2247_s13 = scalar_lea.vmem [#allocation3], %s2858_s30  ;;  %p29_p0 = scmp.ge.s32.totalorder %s32_s29, 4  }
   0x8   : > { %65 = vmatpush.msra.mxu0 %v2804_v0  ;;  %142 = vmatpush.msra.mxu1 %v2804_v0 }
   0x9   : > { %218 = vmatpush.msra.mxu2 %v2804_v0  ;;  %292 = vmatpush.msra.mxu3 %v2809_v1 }
   0xa   : > { %2324 = vmatpush.msk.msrb.mxu0 %vm46_vm0, %v2814_v2  ;;  %2330 = vmatpush.msk.msrb.mxu1 %vm46_vm0, %v2814_v2 }
   0xb   : > { %293 = vmatpush.msra.mxu3 %v2804_v0 }
   0xc   : > { %366 = vmatpush.msrb.mxu0 %v2809_v1  ;;  %440 = vmatpush.msrb.mxu1 %v2809_v1  ;;  %v2983_v1 = vld [vmem:[%s3887_s3 + $0x18] sm:$0xff] (%p29_p0) }
   0xe   : > { %367 = vmatpush.msrb.mxu0 %v2804_v0  ;;  %441 = vmatpush.msrb.mxu1 %v2804_v0  ;;  %v2970_v0 = vld [vmem:[%s3887_s3 + $0x20] sm:$0xff] (%p29_p0) }
  0x77   : > { %v42_v5 = vpop.permute.xlu0 %41 }
  0x78   : > { %2302 = vmatmul.msk.f32.vlgmr.msra.gmra.mxu0 %vm43_vm1, %v42_v5  ;;  %v2311_v5 = vld [vmem:[%s2864_s9 + $0x4] sm:$0x3] }
  0xf5   : > { %v67_v7 = vpop.f32.mrf.mxu0 }
  0xf6   : > { %v68_v8 = vadd.f32 %v67_v7, %v2853_v6 }
  0xf8   : > { %91 = vrot.lane.b32.xlu0 %v68_v8, %s2763_s2  ;;  %v70_v10 = vadd.f32 %v68_v8, %v36_v9 }
  0xfa   : > { %v2303_v11 = vmul.f32 -1.442695, %v70_v10 }
  0xfc   : > { %2555 = vpow2.f32 %v2303_v11 }
 0x102   : > { %v2556_v12 = vpop.eup %2555 }
 0x103   : > { %v74_v13 = vadd.f32 1.0, %v2556_v12 }
 0x105   : > { %2557 = vrcp.f32 %v74_v13  ;;  %v86_v19 = vand.u32 2147483648, %v74_v13  ;;  %vm80_vm3 = vweird.f32 %v74_v13  ;;  %v84_v20 = vand.u32 2147483647, %v74_v13 }
 0x107   : > { %v87_v22 = vor.u32 1.1754944e-38, %v86_v19  ;;  %vm85_vm5 = vcmp.eq.f32.partialorder %v84_v20, 8.507059e+37 }
 0x10b   : > { %v2558_v14 = vpop.eup %2557 }
 0x10c   : > { %v76_v15 = vmul.f32 %v2558_v14, %v74_v13  ;;  %vm81_vm2 = vweird.f32 %v2558_v14 }
 0x10d   : > { %vm82_vm4 = vmor %vm80_vm3, %vm81_vm2 }
 0x10e   : > { %v77_v16 = vsub.f32 1.0, %v76_v15 }
 0x110   : > { %v78_v17 = vmul.f32 %v2558_v14, %v77_v16 }
 0x112   : > { %v79_v18 = vadd.f32 %v2558_v14, %v78_v17 }
 0x114   : > { %v83_v21 = vsel %vm82_vm4, %v2558_v14, %v79_v18 }
 0x115   : > { %v88_v24 = vsel %vm85_vm5, %v87_v22, %v83_v21 }
 0x116   : > { %v101_v29 = vsub.f32 1.0, %v88_v24  ;;  %v107_v31 = vmul.f32 %v2756_v4, %v88_v24 }
 0x16a   : > { %v92_v23 = vpop.permute.xlu0 %91 }
 0x16b   : > { %v94_v25 = vmul.f32 %v92_v23, %v88_v24 }
 0x16d   : > { %96 = vrot.lane.b32.xlu1 %v94_v25, %s2764_s10 }
 0x1df   : > { %v97_v26 = vpop.permute.xlu1 %96 }
 0x1e0   : > { %v99_v27 = vadd.f32 %v97_v26, %v36_v9 }
 0x1e2   : > { %2559 = vtanh.f32 %v99_v27 }
 0x1e8   : > { %v2560_v28 = vpop.eup %2559 }
 0x1e9   : > { %103 = vrot.lane.b32.xlu1 %v2560_v28, %s2762_s1 }
 0x25b   : > { %v104_v30 = vpop.permute.xlu1 %103 }
 0x25c   : > { %v106_v32 = vmul.f32 %v104_v30, %v101_v29 }
 0x25e   : > { %v2870_v33 = vadd.f32 %v107_v31, %v106_v32 }
 0x260   : > { %110 = vrot.lane.b32.xlu2 %v2870_v33, %s2762_s1 }
 0x2ba   : > { %v111_v34 = vpop.permute.xlu2 %110 }
 0x2bb   : > { %115 = vst.msk [vmem:[%s2875_s11] sm:$0x3] %vm114_vm6, %v111_v34  ;;  %2307 = vmatmul.msk.f32.vlgmr.msra.gmra.mxu1 %vm43_vm1, %v111_v34 }
 0x338   : > { %v144_v35 = vpop.f32.mrf.mxu1 }
 0x339   : > { %v145_v36 = vadd.f32 %v144_v35, %v2853_v6  ;;  %v2317_v35 = vld [vmem:[%s2864_s9 + $0x6] sm:$0x3] }
 0x33b   : > { %168 = vrot.lane.b32.xlu2 %v145_v36, %s2763_s2  ;;  %v147_v38 = vadd.f32 %v2305_v37, %v145_v36 }
 0x33d   : > { %v2308_v39 = vmul.f32 -1.442695, %v147_v38 }
 0x33f   : > { %2561 = vpow2.f32 %v2308_v39 }
 0x345   : > { %v2562_v40 = vpop.eup %2561 }
 0x346   : > { %v151_v41 = vadd.f32 1.0, %v2562_v40 }
 0x348   : > { %2563 = vrcp.f32 %v151_v41  ;;  %v163_v47 = vand.u32 2147483648, %v151_v41  ;;  %vm157_vm8 = vweird.f32 %v151_v41  ;;  %v161_v48 = vand.u32 2147483647, %v151_v41 }
 0x34a   : > { %v164_v50 = vor.u32 1.1754944e-38, %v163_v47  ;;  %vm162_vm10 = vcmp.eq.f32.partialorder %v161_v48, 8.507059e+37 }
 0x34e   : > { %v2564_v42 = vpop.eup %2563 }
 0x34f   : > { %v153_v43 = vmul.f32 %v2564_v42, %v151_v41  ;;  %vm158_vm7 = vweird.f32 %v2564_v42 }
 0x350   : > { %vm159_vm9 = vmor %vm157_vm8, %vm158_vm7 }
 0x351   : > { %v154_v44 = vsub.f32 1.0, %v153_v43 }
 0x353   : > { %v155_v45 = vmul.f32 %v2564_v42, %v154_v44 }
 0x355   : > { %v156_v46 = vadd.f32 %v2564_v42, %v155_v45 }
 0x357   : > { %v160_v49 = vsel %vm159_vm9, %v2564_v42, %v156_v46 }
 0x358   : > { %v165_v52 = vsel %vm162_vm10, %v164_v50, %v160_v49 }
 0x359   : > { %v178_v57 = vsub.f32 1.0, %v165_v52  ;;  %v184_v59 = vmul.f32 %v165_v52, %v2870_v33 }
 0x395   : > { %v169_v51 = vpop.permute.xlu2 %168 }
 0x396   : > { %v171_v53 = vmul.f32 %v169_v51, %v165_v52 }
 0x398   : > { %173 = vrot.lane.b32.xlu0 %v171_v53, %s2764_s10 }
 0x40a   : > { %v174_v54 = vpop.permute.xlu0 %173 }
 0x40b   : > { %v176_v55 = vadd.f32 %v2305_v37, %v174_v54 }
 0x40d   : > { %2565 = vtanh.f32 %v176_v55 }
 0x413   : > { %v2566_v56 = vpop.eup %2565 }
 0x414   : > { %180 = vrot.lane.b32.xlu1 %v2566_v56, %s2762_s1 }
 0x486   : > { %v181_v58 = vpop.permute.xlu1 %180 }
 0x487   : > { %v183_v60 = vmul.f32 %v181_v58, %v178_v57 }
 0x489   : > { %v2886_v61 = vadd.f32 %v184_v59, %v183_v60 }
 0x48b   : > { %187 = vrot.lane.b32.xlu2 %v2886_v61, %s2762_s1 }
 0x4e5   : > { %v188_v62 = vpop.permute.xlu2 %187 }
 0x4e6   : > { %2309 = vst.msk [vmem:[%s2875_s11 + $0x2] sm:$0x3] %vm114_vm6, %v188_v62  ;;  %2313 = vmatmul.msk.f32.vlgmr.msra.gmra.mxu2 %vm43_vm1, %v188_v62 }
 0x569   : > { %v220_v63 = vpop.f32.mrf.mxu2 }
 0x56a   : > { %v221_v4 = vadd.f32 %v220_v63, %v2853_v6 }
 0x56c   : > { %244 = vrot.lane.b32.xlu0 %v221_v4, %s2763_s2  ;;  %v223_v7 = vadd.f32 %v2311_v5, %v221_v4  ;;  %v2323_v4 = vld [vmem:[%s2864_s9 + $0x8] sm:$0x3] }
 0x56e   : > { %v2314_v8 = vmul.f32 -1.442695, %v223_v7 }
 0x570   : > { %2567 = vpow2.f32 %v2314_v8 }
 0x576   : > { %v2568_v9 = vpop.eup %2567 }
 0x577   : > { %v227_v10 = vadd.f32 1.0, %v2568_v9 }
 0x579   : > { %2569 = vrcp.f32 %v227_v10  ;;  %v239_v16 = vand.u32 2147483648, %v227_v10  ;;  %vm233_vm12 = vweird.f32 %v227_v10  ;;  %v237_v17 = vand.u32 2147483647, %v227_v10 }
 0x57b   : > { %v240_v19 = vor.u32 1.1754944e-38, %v239_v16  ;;  %vm238_vm14 = vcmp.eq.f32.partialorder %v237_v17, 8.507059e+37 }
 0x57f   : > { %v2570_v11 = vpop.eup %2569 }
 0x580   : > { %v229_v12 = vmul.f32 %v2570_v11, %v227_v10  ;;  %vm234_vm11 = vweird.f32 %v2570_v11 }
 0x581   : > { %vm235_vm13 = vmor %vm233_vm12, %vm234_vm11  ;;  %vm551_vm12 = vcmask (%p29_p0), 80896  }
 0x582   : > { %v230_v13 = vsub.f32 1.0, %v229_v12 }
 0x584   : > { %v231_v14 = vmul.f32 %v2570_v11, %v230_v13 }
 0x586   : > { %v232_v15 = vadd.f32 %v2570_v11, %v231_v14 }
 0x588   : > { %v236_v18 = vsel %vm235_vm13, %v2570_v11, %v232_v15  ;;  %vm1754_vm13 = vcmask (%p29_p0), 156672  }
 0x589   : > { %v241_v21 = vsel %vm238_vm14, %v240_v19, %v236_v18  ;;  %vm1827_vm14 = vcmask (%p29_p0), 1041408  }
 0x58a   : > { %v254_v26 = vsub.f32 1.0, %v241_v21  ;;  %v260_v28 = vmul.f32 %v241_v21, %v2886_v61 }
 0x5de   : > { %v245_v20 = vpop.permute.xlu0 %244 }
 0x5df   : > { %v247_v22 = vmul.f32 %v245_v20, %v241_v21 }
 0x5e1   : > { %249 = vrot.lane.b32.xlu1 %v247_v22, %s2764_s10 }
 0x653   : > { %v250_v23 = vpop.permute.xlu1 %249 }
 0x654   : > { %v252_v24 = vadd.f32 %v2311_v5, %v250_v23 }
 0x656   : > { %2571 = vtanh.f32 %v252_v24 }
 0x65c   : > { %v2572_v25 = vpop.eup %2571 }
 0x65d   : > { %256 = vrot.lane.b32.xlu2 %v2572_v25, %s2762_s1 }
 0x6b7   : > { %v257_v27 = vpop.permute.xlu2 %256 }
 0x6b8   : > { %v259_v29 = vmul.f32 %v257_v27, %v254_v26 }
 0x6ba   : > { %v2899_v30 = vadd.f32 %v260_v28, %v259_v29 }
 0x6bc   : > { %263 = vrot.lane.b32.xlu0 %v2899_v30, %s2762_s1 }
 0x72e   : > { %v264_v31 = vpop.permute.xlu0 %263 }
 0x72f   : > { %2315 = vst.msk [vmem:[%s2875_s11 + $0x4] sm:$0x3] %vm114_vm6, %v264_v31  ;;  %2319 = vmatmul.msk.f32.vlgmr.msra.gmra.mxu3 %vm43_vm1, %v264_v31 }
 0x7b2   : > { %v295_v32 = vpop.f32.mrf.mxu3 }
 0x7b3   : > { %v296_v34 = vadd.f32 %v295_v32, %v2853_v6 }
 0x7b5   : > { %319 = vrot.lane.b32.xlu1 %v296_v34, %s2763_s2  ;;  %v298_v36 = vadd.f32 %v2317_v35, %v296_v34 }
 0x7b7   : > { %v2320_v37 = vmul.f32 -1.442695, %v298_v36 }
 0x7b9   : > { %2573 = vpow2.f32 %v2320_v37 }
 0x7bf   : > { %v2574_v38 = vpop.eup %2573 }
 0x7c0   : > { %v302_v39 = vadd.f32 1.0, %v2574_v38 }
 0x7c2   : > { %2575 = vrcp.f32 %v302_v39  ;;  %v314_v45 = vand.u32 2147483648, %v302_v39  ;;  %vm308_vm0 = vweird.f32 %v302_v39  ;;  %v312_v46 = vand.u32 2147483647, %v302_v39 }
 0x7c4   : > { %v315_v48 = vor.u32 1.1754944e-38, %v314_v45  ;;  %vm313_vm3 = vcmp.eq.f32.partialorder %v312_v46, 8.507059e+37 }
 0x7c8   : > { %v2576_v40 = vpop.eup %2575 }
 0x7c9   : > { %v304_v41 = vmul.f32 %v2576_v40, %v302_v39  ;;  %vm309_vm15 = vweird.f32 %v2576_v40 }
 0x7ca   : > { %vm310_vm2 = vmor %vm308_vm0, %vm309_vm15 }
 0x7cb   : > { %v305_v42 = vsub.f32 1.0, %v304_v41 }
 0x7cd   : > { %v306_v43 = vmul.f32 %v2576_v40, %v305_v42 }
 0x7cf   : > { %v307_v44 = vadd.f32 %v2576_v40, %v306_v43 }
 0x7d1   : > { %v311_v47 = vsel %vm310_vm2, %v2576_v40, %v307_v44 }
 0x7d2   : > { %v316_v50 = vsel %vm313_vm3, %v315_v48, %v311_v47 }
 0x7d3   : > { %v329_v55 = vsub.f32 1.0, %v316_v50  ;;  %v335_v57 = vmul.f32 %v316_v50, %v2899_v30 }
 0x827   : > { %v320_v49 = vpop.permute.xlu1 %319 }
 0x828   : > { %v322_v51 = vmul.f32 %v320_v49, %v316_v50 }
 0x82a   : > { %324 = vrot.lane.b32.xlu2 %v322_v51, %s2764_s10 }
 0x884   : > { %v325_v52 = vpop.permute.xlu2 %324 }
 0x885   : > { %v327_v53 = vadd.f32 %v2317_v35, %v325_v52  ;;  %v2329_v35 = vld [vmem:[%s2864_s9 + $0xa] sm:$0x3] }
 0x887   : > { %2577 = vtanh.f32 %v327_v53 }
 0x88d   : > { %v2578_v54 = vpop.eup %2577 }
 0x88e   : > { %331 = vrot.lane.b32.xlu0 %v2578_v54, %s2762_s1 }
 0x900   : > { %v332_v56 = vpop.permute.xlu0 %331 }
 0x901   : > { %v334_v58 = vmul.f32 %v332_v56, %v329_v55 }
 0x903   : > { %v336_v59 = vadd.f32 %v335_v57, %v334_v58 }
 0x905   : > { %338 = vrot.lane.b32.xlu1 %v336_v59, %s2762_s1 }
 0x977   : > { %v339_v60 = vpop.permute.xlu1 %338 }
 0x978   : > { %2321 = vst.msk [vmem:[%s2875_s11 + $0x6] sm:$0x3] %vm114_vm6, %v339_v60  ;;  %2325 = vmatmul.msk.f32.vlgmr.msrb.gmra.mxu0 %vm43_vm1, %v339_v60 }
 0x9f5   : > { %v369_v62 = vpop.f32.mrf.mxu0 }
 0x9f6   : > { %v370_v63 = vadd.f32 %v369_v62, %v2853_v6 }
 0x9f8   : > { %393 = vrot.lane.b32.xlu2 %v370_v63, %s2763_s2  ;;  %v372_v5 = vadd.f32 %v2323_v4, %v370_v63 }
 0x9fa   : > { %v2326_v7 = vmul.f32 -1.442695, %v372_v5 }
 0x9fc   : > { %2579 = vpow2.f32 %v2326_v7 }
 0xa02   : > { %v2580_v8 = vpop.eup %2579 }
 0xa03   : > { %v376_v9 = vadd.f32 1.0, %v2580_v8 }
 0xa05   : > { %2581 = vrcp.f32 %v376_v9  ;;  %v388_v15 = vand.u32 2147483648, %v376_v9  ;;  %vm382_vm5 = vweird.f32 %v376_v9  ;;  %v386_v16 = vand.u32 2147483647, %v376_v9 }
 0xa07   : > { %v389_v18 = vor.u32 1.1754944e-38, %v388_v15  ;;  %vm387_vm8 = vcmp.eq.f32.partialorder %v386_v16, 8.507059e+37 }
 0xa0b   : > { %v2582_v10 = vpop.eup %2581 }
 0xa0c   : > { %v378_v11 = vmul.f32 %v2582_v10, %v376_v9  ;;  %vm383_vm4 = vweird.f32 %v2582_v10 }
 0xa0d   : > { %vm384_vm7 = vmor %vm382_vm5, %vm383_vm4 }
 0xa0e   : > { %v379_v12 = vsub.f32 1.0, %v378_v11 }
 0xa10   : > { %v380_v13 = vmul.f32 %v2582_v10, %v379_v12 }
 0xa12   : > { %v381_v14 = vadd.f32 %v2582_v10, %v380_v13 }
 0xa14   : > { %v385_v17 = vsel %vm384_vm7, %v2582_v10, %v381_v14 }
 0xa15   : > { %v390_v20 = vsel %vm387_vm8, %v389_v18, %v385_v17 }
 0xa16   : > { %v403_v25 = vsub.f32 1.0, %v390_v20  ;;  %v409_v27 = vmul.f32 %v390_v20, %v336_v59 }
 0xa52   : > { %v394_v19 = vpop.permute.xlu2 %393 }
 0xa53   : > { %v396_v21 = vmul.f32 %v394_v19, %v390_v20 }
 0xa55   : > { %398 = vrot.lane.b32.xlu0 %v396_v21, %s2764_s10 }
 0xac7   : > { %v399_v22 = vpop.permute.xlu0 %398 }
 0xac8   : > { %v401_v23 = vadd.f32 %v2323_v4, %v399_v22 }
 0xaca   : > { %2583 = vtanh.f32 %v401_v23  ;;  %v3128_v23 = vld [vmem:[%s3887_s3 + $0x10] sm:$0xf] (%p29_p0) }
 0xad0   : > { %v2584_v24 = vpop.eup %2583 }
 0xad1   : > { %405 = vrot.lane.b32.xlu1 %v2584_v24, %s2762_s1 }
 0xb43   : > { %v406_v26 = vpop.permute.xlu1 %405 }
 0xb44   : > { %v408_v28 = vmul.f32 %v406_v26, %v403_v25 }
 0xb46   : > { %v410_v29 = vadd.f32 %v409_v27, %v408_v28  ;;  %v3149_v28 = vld [vmem:[%s3887_s3 + $0x8] sm:$0xff] (%p29_p0) }
 0xb48   : > { %412 = vrot.lane.b32.xlu2 %v410_v29, %s2762_s1 }
 0xba2   : > { %v413_v31 = vpop.permute.xlu2 %412 }
 0xba3   : > { %2327 = vst.msk [vmem:[%s2875_s11 + $0x8] sm:$0x3] %vm114_vm6, %v413_v31  ;;  %2331 = vmatmul.msk.f32.vlgmr.msrb.gmra.mxu1 %vm43_vm1, %v413_v31 }
 0xc20   : > { %v443_v32 = vpop.f32.mrf.mxu1 }
 0xc21   : > { %v444_v34 = vadd.f32 %v443_v32, %v2853_v6 }
 0xc23   : > { %467 = vrot.lane.b32.xlu0 %v444_v34, %s2763_s2  ;;  %v446_v36 = vadd.f32 %v2329_v35, %v444_v34 }
 0xc25   : > { %v2332_v37 = vmul.f32 -1.442695, %v446_v36 }
 0xc27   : > { %2585 = vpow2.f32 %v2332_v37 }
 0xc2b   : > { %116 = vrot.lane.b32.xlu0 %v2870_v33, %s2765_s12 }
 0xc2d   : > { %v2586_v38 = vpop.eup %2585 }
 0xc2e   : > { %v450_v39 = vadd.f32 1.0, %v2586_v38 }
 0xc30   : > { %2587 = vrcp.f32 %v450_v39  ;;  %v462_v44 = vand.u32 2147483648, %v450_v39  ;;  %vm456_vm9 = vweird.f32 %v450_v39  ;;  %v460_v45 = vand.u32 2147483647, %v450_v39 }
 0xc32   : > { %v463_v46 = vor.u32 1.1754944e-38, %v462_v44  ;;  %vm461_vm11 = vcmp.eq.f32.partialorder %v460_v45, 8.507059e+37 }
 0xc33   : > { %343 = vrot.lane.b32.xlu0 %v336_v59, %s2765_s12 }
 0xc36   : > { %v2588_v40 = vpop.eup %2587 }
 0xc37   : > { %v452_v41 = vmul.f32 %v2588_v40, %v450_v39  ;;  %vm457_vm1 = vweird.f32 %v2588_v40 }
 0xc38   : > { %vm458_vm10 = vmor %vm456_vm9, %vm457_vm1 }
 0xc39   : > { %v453_v42 = vsub.f32 1.0, %v452_v41 }
 0xc3b   : > { %v454_v6 = vmul.f32 %v2588_v40, %v453_v42 }
 0xc3d   : > { %v455_v43 = vadd.f32 %v2588_v40, %v454_v6 }
 0xc3f   : > { %v459_v33 = vsel %vm458_vm10, %v2588_v40, %v455_v43 }
 0xc40   : > { %v464_v48 = vsel %vm461_vm11, %v463_v46, %v459_v33 }
 0xc41   : > { %v483_v58 = vmul.f32 %v464_v48, %v410_v29 }
 0xc95   : > { %v468_v47 = vpop.permute.xlu0 %467 }
 0xc96   : > { %v470_v49 = vmul.f32 %v468_v47, %v464_v48 }
 0xc98   : > { %472 = vrot.lane.b32.xlu1 %v470_v49, %s2764_s10 }
 0xc9d   : > { %v117_v50 = vpop.permute.xlu0 %116 }
 0xc9e   : > { %2304 = vst.msk [vmem:[%s2247_s13 + $0xa] sm:$0x3] %vm114_vm6, %v117_v50 }
 0xca0   : > { %192 = vrot.lane.b32.xlu1 %v2886_v61, %s2765_s12  ;;  %v477_v61 = vsub.f32 1.0, %v464_v48 }
 0xca5   : > { %v344_v51 = vpop.permute.xlu0 %343 }
 0xca6   : > { %2322 = vst.msk [vmem:[%s2247_s13 + $0x4] sm:$0x3] %vm114_vm6, %v344_v51 }
 0xca8   : > { %417 = vrot.lane.b32.xlu1 %v410_v29, %s2765_s12  ;;  %v3166_v29 = vld [vmem:[%s3887_s3] sm:$0xff] (%p29_p0) }
 0xd0a   : > { %v473_v52 = vpop.permute.xlu1 %472 }
 0xd0b   : > { %v475_v53 = vadd.f32 %v2329_v35, %v473_v52 }
 0xd0d   : > { %2589 = vtanh.f32 %v475_v53 }
 0xd12   : > { %v193_v54 = vpop.permute.xlu1 %192 }
 0xd13   : > { %v2590_v55 = vpop.eup %2589  ;;  %2310 = vst.msk [vmem:[%s2247_s13 + $0x8] sm:$0x3] %vm114_vm6, %v193_v54 }
 0xd14   : > { %479 = vrot.lane.b32.xlu2 %v2590_v55, %s2762_s1 }
 0xd1a   : > { %v418_v56 = vpop.permute.xlu1 %417 }
 0xd1b   : > { %2328 = vst.msk [vmem:[%s2247_s13 + $0x2] sm:$0x3] %vm114_vm6, %v418_v56 }
 0xd1c   : > { %268 = vrot.lane.b32.xlu2 %v2899_v30, %s2765_s12  ;;  %v2957_v30 = vld [vmem:[%s3887_s3 + $0x28] sm:$0xf] (%p29_p0) }
 0xd1d   :  { %2337 = vmatpush.xpose.msk.msra.mxu0 (%p29_p0), %vm551_vm12, %v2957_v30  ;;  %2341 = vmatpush.xpose.msk.msra.mxu1 (%p29_p0), %vm551_vm12, %v2957_v30 }
 0xd1e   :  { %2345 = vmatpush.xpose.msk.msra.mxu2 (%p29_p0), %vm551_vm12, %v2957_v30  ;;  %2349 = vmatpush.xpose.msk.msra.mxu3 (%p29_p0), %vm551_vm12, %v2957_v30 }
 0xd21   :  { %2338 = vmatpush.xpose.msk.msra.mxu0 (%p29_p0), %vm551_vm12, %v2970_v0  ;;  %2342 = vmatpush.xpose.msk.msra.mxu1 (%p29_p0), %vm551_vm12, %v2970_v0 }
 0xd22   :  { %2346 = vmatpush.xpose.msk.msra.mxu2 (%p29_p0), %vm551_vm12, %v2970_v0  ;;  %2350 = vmatpush.xpose.msk.msra.mxu3 (%p29_p0), %vm551_vm12, %v2970_v0 }
 0xd25   :  { %2339 = vmatpush.xpose.msk.msra.mxu0 (%p29_p0), %vm551_vm12, %v2983_v1  ;;  %2343 = vmatpush.xpose.msk.msra.mxu1 (%p29_p0), %vm551_vm12, %v2983_v1 }
 0xd26   :  { %2347 = vmatpush.xpose.msk.msra.mxu2 (%p29_p0), %vm551_vm12, %v2983_v1  ;;  %2351 = vmatpush.xpose.msk.msra.mxu3 (%p29_p0), %vm551_vm12, %v2983_v1 }
 0xd29   :  { %2353 = vmatpush.xpose.msk.msrb.mxu0 (%p29_p0), %vm551_vm12, %v2957_v30  ;;  %2357 = vmatpush.xpose.msk.msrb.mxu1 (%p29_p0), %vm551_vm12, %v2957_v30 }
 0xd2a   :  { %2361 = vmatpush.xpose.msk.msrb.mxu2 (%p29_p0), %vm551_vm12, %v2957_v30  ;;  %2365 = vmatpush.xpose.msk.msrb.mxu3 (%p29_p0), %vm551_vm12, %v2957_v30 }
 0xd2d   :  { %2354 = vmatpush.xpose.msk.msrb.mxu0 (%p29_p0), %vm551_vm12, %v2970_v0  ;;  %2358 = vmatpush.xpose.msk.msrb.mxu1 (%p29_p0), %vm551_vm12, %v2970_v0 }
 0xd2e   :  { %2362 = vmatpush.xpose.msk.msrb.mxu2 (%p29_p0), %vm551_vm12, %v2970_v0  ;;  %2366 = vmatpush.xpose.msk.msrb.mxu3 (%p29_p0), %vm551_vm12, %v2970_v0 }
 0xd31   :  { %2355 = vmatpush.xpose.msk.msrb.mxu0 (%p29_p0), %vm551_vm12, %v2983_v1  ;;  %2359 = vmatpush.xpose.msk.msrb.mxu1 (%p29_p0), %vm551_vm12, %v2983_v1 }
 0xd32   :  { %2363 = vmatpush.xpose.msk.msrb.mxu2 (%p29_p0), %vm551_vm12, %v2983_v1  ;;  %2367 = vmatpush.xpose.msk.msrb.mxu3 (%p29_p0), %vm551_vm12, %v2983_v1 }
 0xd6e   : > { %v480_v57 = vpop.permute.xlu2 %479 }
 0xd6f   : > { %v482_v59 = vmul.f32 %v480_v57, %v477_v61 }
 0xd71   : > { %v484_v4 = vadd.f32 %v483_v58, %v482_v59  }
 0xd73   : > { %491 = vrot.lane.b32.xlu0 %v484_v4, %s2765_s12  ;;  %486 = vrot.lane.b32.xlu2 %v484_v4, %s2762_s1 }
 0xd76   : > { %v269_v60 = vpop.permute.xlu2 %268 }
 0xd77   : > { %2316 = vst.msk [vmem:[%s2247_s13 + $0x6] sm:$0x3] %vm114_vm6, %v269_v60 }
 0xdcd   : > { %v487_v62 = vpop.permute.xlu2 %486 }
 0xdce   : > { %2333 = vst.msk [vmem:[%s2875_s11 + $0xa] sm:$0x3] %vm114_vm6, %v487_v62 }
 0xdd5   :  { %v496_v31 = vld [vmem:[#allocation2] sm:$0x3] (%p29_p0)  ;;  %v497_v32 = vld [vmem:[#allocation2 + $0x2] sm:$0x3] (%p29_p0)  ;;  %v498_v34 = vld [vmem:[#allocation2 + $0x4] sm:$0x3] (%p29_p0) }
 0xdd6   :  { %v499_v35 = vld [vmem:[#allocation2 + $0x6] sm:$0x3] (%p29_p0)  ;;  %v500_v36 = vld [vmem:[#allocation2 + $0x8] sm:$0x3] (%p29_p0)  ;;  %v501_v37 = vld [vmem:[#allocation2 + $0xa] sm:$0x3] (%p29_p0) }
 0xdd7   :  { %v502_v38 = vld [vmem:[#allocation2 + $0xc] sm:$0x3] (%p29_p0)  ;;  %v503_v39 = vld [vmem:[#allocation2 + $0xe] sm:$0x3] (%p29_p0)  ;;  %v504_v40 = vld [vmem:[#allocation2 + $0x10] sm:$0x3] (%p29_p0) }
 0xdd8   :  { %v505_v41 = vld [vmem:[#allocation2 + $0x12] sm:$0x3] (%p29_p0)  ;;  %v506_v42 = vld [vmem:[#allocation2 + $0x14] sm:$0x3] (%p29_p0)  ;;  %v507_v6 = vld [vmem:[#allocation2 + $0x16] sm:$0x3] (%p29_p0) }
 0xdd9   :  { %v3260_v43 = vld [vmem:[#allocation2 + $0x18] sm:$0x3] (%p29_p0)  ;;  %v509_v44 = vld [vmem:[#allocation2 + $0x1a] sm:$0x3] (%p29_p0)  ;;  %v510_v45 = vld [vmem:[#allocation2 + $0x1c] sm:$0x3] (%p29_p0) }
 0xdda   :  { %v511_v33 = vld [vmem:[#allocation2 + $0x1e] sm:$0x3] (%p29_p0)  ;;  %v512_v46 = vld [vmem:[#allocation2 + $0x20] sm:$0x3] (%p29_p0)  ;;  %v513_v47 = vld [vmem:[#allocation2 + $0x22] sm:$0x3] (%p29_p0) }
 0xddb   :  { %v3295_v48 = vld [vmem:[#allocation2 + $0x24] sm:$0x3] (%p29_p0)  ;;  %v3297_v49 = vld [vmem:[#allocation2 + $0x26] sm:$0x3] (%p29_p0)  ;;  %v516_v50 = vld [vmem:[#allocation2 + $0x28] sm:$0x3] (%p29_p0) }
 0xddc   :  { %v517_v51 = vld [vmem:[#allocation2 + $0x2a] sm:$0x3] (%p29_p0)  ;;  %v518_v52 = vld [vmem:[#allocation2 + $0x2c] sm:$0x3] (%p29_p0)  ;;  %v519_v53 = vld [vmem:[#allocation2 + $0x2e] sm:$0x3] (%p29_p0) }
 0xde2   :  { %31 = sbr.rel (!%p29_p0) target bundleno = 3 (0x3), region = 71 }
 0xde5   : > { %v492_v63 = vpop.permute.xlu0 %491 }
 0xde6   : > { %495 = vst.msk [vmem:[%s2247_s13] sm:$0x3] %vm114_vm6, %v492_v63 }
 0xded   :  { %v520_v2 = vld [vmem:[#allocation3] sm:$0x3]  ;;  %v521_v3 = vld [vmem:[#allocation3 + $0x2] sm:$0x3]  ;;  %v522_v4 = vld [vmem:[#allocation3 + $0x4] sm:$0x3] }
 0xdee   :  { %v523_v5 = vld [vmem:[#allocation3 + $0x6] sm:$0x3]  ;;  %2340 = vmatmul.msk.f32.vlgmr.msra.gmra.mxu0 %vm551_vm12, %v520_v2  ;;  %2344 = vmatmul.msk.f32.vlgmr.msra.gmra.mxu1 %vm551_vm12, %v521_v3  ;;  %v524_v7 = vld [vmem:[#allocation3 + $0x8] sm:$0x3]  ;;  %v525_v8 = vld [vmem:[#allocation3 + $0xa] sm:$0x3] }
 0xdef   :  { %2348 = vmatmul.msk.f32.vlgmr.msra.gmra.mxu2 %vm551_vm12, %v522_v4  ;;  %2352 = vmatmul.msk.f32.vlgmr.msra.gmra.mxu3 %vm551_vm12, %v523_v5  ;;  %v526_v9 = vld [vmem:[#allocation3 + $0xc] sm:$0x3]  ;;  %v527_v10 = vld [vmem:[#allocation3 + $0xe] sm:$0x3]  ;;  %v528_v11 = vld [vmem:[#allocation3 + $0x10] sm:$0x3] }
 0xdf0   :  { %2369 = vmatpush.xpose.msk.msra.mxu0 %vm551_vm12, %v2957_v30  ;;  %2373 = vmatpush.xpose.msk.msra.mxu1 %vm551_vm12, %v2957_v30  ;;  %v529_v12 = vld [vmem:[#allocation3 + $0x12] sm:$0x3]  ;;  %v530_v13 = vld [vmem:[#allocation3 + $0x14] sm:$0x3]  ;;  %v531_v14 = vld [vmem:[#allocation3 + $0x16] sm:$0x3] }
 0xdf1   :  { %2377 = vmatpush.xpose.msk.msra.mxu2 %vm551_vm12, %v2957_v30  ;;  %2381 = vmatpush.xpose.msk.msra.mxu3 %vm551_vm12, %v2957_v30  ;;  %v532_v15 = vld [vmem:[#allocation3 + $0x18] sm:$0x3]  ;;  %v533_v16 = vld [vmem:[#allocation3 + $0x1a] sm:$0x3]  ;;  %v534_v17 = vld [vmem:[#allocation3 + $0x1c] sm:$0x3] }
 0xdf2   :  { %v535_v18 = vld [vmem:[#allocation3 + $0x1e] sm:$0x3]  ;;  %v536_v19 = vld [vmem:[#allocation3 + $0x20] sm:$0x3]  ;;  %v537_v20 = vld [vmem:[#allocation3 + $0x22] sm:$0x3] }
 0xdf3   :  { %v538_v21 = vld [vmem:[#allocation3 + $0x24] sm:$0x3]  ;;  %v539_v22 = vld [vmem:[#allocation3 + $0x26] sm:$0x3]  ;;  %v540_v24 = vld [vmem:[#allocation3 + $0x28] sm:$0x3] }
 0xdf4   :  { %2370 = vmatpush.xpose.msk.msra.mxu0 %vm551_vm12, %v2970_v0  ;;  %2374 = vmatpush.xpose.msk.msra.mxu1 %vm551_vm12, %v2970_v0  ;;  %v541_v25 = vld [vmem:[#allocation3 + $0x2a] sm:$0x3]  ;;  %v542_v26 = vld [vmem:[#allocation3 + $0x2c] sm:$0x3]  ;;  %v543_v27 = vld [vmem:[#allocation3 + $0x2e] sm:$0x3] }
 0xdf5   :  { %2378 = vmatpush.xpose.msk.msra.mxu2 %vm551_vm12, %v2970_v0  ;;  %2382 = vmatpush.xpose.msk.msra.mxu3 %vm551_vm12, %v2970_v0 }
 0xdf6   :  { %2356 = vmatmul.msk.f32.vlgmr.msrb.gmra.mxu0 %vm551_vm12, %v524_v7  ;;  %2360 = vmatmul.msk.f32.vlgmr.msrb.gmra.mxu1 %vm551_vm12, %v525_v8 }
 0xdf7   :  { %2364 = vmatmul.msk.f32.vlgmr.msrb.gmra.mxu2 %vm551_vm12, %v526_v9  ;;  %2368 = vmatmul.msk.f32.vlgmr.msrb.gmra.mxu3 %vm551_vm12, %v527_v10 }
 0xdf8   :  { %2371 = vmatpush.xpose.msk.msra.mxu0 %vm551_vm12, %v2983_v1  ;;  %2375 = vmatpush.xpose.msk.msra.mxu1 %vm551_vm12, %v2983_v1 }
 0xdf9   :  { %2379 = vmatpush.xpose.msk.msra.mxu2 %vm551_vm12, %v2983_v1  ;;  %2383 = vmatpush.xpose.msk.msra.mxu3 %vm551_vm12, %v2983_v1 }
 0xdfc   :  { %2385 = vmatpush.xpose.msk.msrb.mxu0 %vm551_vm12, %v2957_v30  ;;  %2389 = vmatpush.xpose.msk.msrb.mxu1 %vm551_vm12, %v2957_v30 }
 0xdfd   :  { %2393 = vmatpush.xpose.msk.msrb.mxu2 %vm551_vm12, %v2957_v30  ;;  %2397 = vmatpush.xpose.msk.msrb.mxu3 %vm551_vm12, %v2957_v30 }
 0xdfe   :  { %2372 = vmatmul.msk.f32.vlgmr.msra.gmra.mxu0 %vm551_vm12, %v528_v11  ;;  %2376 = vmatmul.msk.f32.vlgmr.msra.gmra.mxu1 %vm551_vm12, %v529_v12 }
 0xdff   :  { %2380 = vmatmul.msk.f32.vlgmr.msra.gmra.mxu2 %vm551_vm12, %v530_v13  ;;  %2384 = vmatmul.msk.f32.vlgmr.msra.gmra.mxu3 %vm551_vm12, %v531_v14  ;;  %v3360_v14 = vld [vmem:[%s3888_s4] ss:$0 sm:$0xff] }
 0xe00   :  { %2386 = vmatpush.xpose.msk.msrb.mxu0 %vm551_vm12, %v2970_v0  ;;  %2390 = vmatpush.xpose.msk.msrb.mxu1 %vm551_vm12, %v2970_v0 }
 0xe01   :  { %2394 = vmatpush.xpose.msk.msrb.mxu2 %vm551_vm12, %v2970_v0  ;;  %2398 = vmatpush.xpose.msk.msrb.mxu3 %vm551_vm12, %v2970_v0 }
 0xe04   :  { %2387 = vmatpush.xpose.msk.msrb.mxu0 %vm551_vm12, %v2983_v1  ;;  %2391 = vmatpush.xpose.msk.msrb.mxu1 %vm551_vm12, %v2983_v1 }
 0xe05   :  { %2395 = vmatpush.xpose.msk.msrb.mxu2 %vm551_vm12, %v2983_v1  ;;  %2399 = vmatpush.xpose.msk.msrb.mxu3 %vm551_vm12, %v2983_v1 }
 0xe07   :  { %2388 = vmatmul.msk.f32.vlgmr.msrb.gmra.mxu0 %vm551_vm12, %v532_v15  ;;  %2392 = vmatmul.msk.f32.vlgmr.msrb.gmra.mxu1 %vm551_vm12, %v533_v16 }
 0xe08   :  { %2401 = vmatpush.xpose.msk.msra.mxu0 %vm551_vm12, %v2957_v30  ;;  %2405 = vmatpush.xpose.msk.msra.mxu1 %vm551_vm12, %v2957_v30 }
 0xe09   :  { %2409 = vmatpush.xpose.msk.msra.mxu2 %vm551_vm12, %v2957_v30  ;;  %2413 = vmatpush.xpose.msk.msra.mxu3 %vm551_vm12, %v2957_v30 }
 0xe0a   :  { %2396 = vmatmul.msk.f32.vlgmr.msrb.gmra.mxu2 %vm551_vm12, %v534_v17  ;;  %2400 = vmatmul.msk.f32.vlgmr.msrb.gmra.mxu3 %vm551_vm12, %v535_v18 }
 0xe0c   :  { %2402 = vmatpush.xpose.msk.msra.mxu0 %vm551_vm12, %v2970_v0  ;;  %2406 = vmatpush.xpose.msk.msra.mxu1 %vm551_vm12, %v2970_v0 }
 0xe0d   :  { %2410 = vmatpush.xpose.msk.msra.mxu2 %vm551_vm12, %v2970_v0  ;;  %2414 = vmatpush.xpose.msk.msra.mxu3 %vm551_vm12, %v2970_v0 }
 0xe10   :  { %2403 = vmatpush.xpose.msk.msra.mxu0 %vm551_vm12, %v2983_v1  ;;  %2407 = vmatpush.xpose.msk.msra.mxu1 %vm551_vm12, %v2983_v1 }
 0xe11   :  { %2411 = vmatpush.xpose.msk.msra.mxu2 %vm551_vm12, %v2983_v1  ;;  %2415 = vmatpush.xpose.msk.msra.mxu3 %vm551_vm12, %v2983_v1 }
 0xe13   :  { %2404 = vmatmul.msk.f32.vlgmr.msra.gmra.mxu0 %vm551_vm12, %v536_v19  ;;  %2408 = vmatmul.msk.f32.vlgmr.msra.gmra.mxu1 %vm551_vm12, %v537_v20 }
 0xe14   :  { %2417 = vmatpush.xpose.msk.msrb.mxu0 %vm551_vm12, %v2957_v30  ;;  %2421 = vmatpush.xpose.msk.msrb.mxu1 %vm551_vm12, %v2957_v30 }
 0xe15   :  { %2425 = vmatpush.xpose.msk.msrb.mxu2 %vm551_vm12, %v2957_v30  ;;  %2429 = vmatpush.xpose.msk.msrb.mxu3 %vm551_vm12, %v2957_v30 }
 0xe16   :  { %2412 = vmatmul.msk.f32.vlgmr.msra.gmra.mxu2 %vm551_vm12, %v538_v21  ;;  %2416 = vmatmul.msk.f32.vlgmr.msra.gmra.mxu3 %vm551_vm12, %v539_v22 }
 0xe18   :  { %2418 = vmatpush.xpose.msk.msrb.mxu0 %vm551_vm12, %v2970_v0  ;;  %2422 = vmatpush.xpose.msk.msrb.mxu1 %vm551_vm12, %v2970_v0 }
 0xe19   :  { %2426 = vmatpush.xpose.msk.msrb.mxu2 %vm551_vm12, %v2970_v0  ;;  %2430 = vmatpush.xpose.msk.msrb.mxu3 %vm551_vm12, %v2970_v0 }
 0xe1c   :  { %2419 = vmatpush.xpose.msk.msrb.mxu0 %vm551_vm12, %v2983_v1  ;;  %2423 = vmatpush.xpose.msk.msrb.mxu1 %vm551_vm12, %v2983_v1 }
 0xe1d   :  { %2427 = vmatpush.xpose.msk.msrb.mxu2 %vm551_vm12, %v2983_v1  ;;  %2431 = vmatpush.xpose.msk.msrb.mxu3 %vm551_vm12, %v2983_v1 }
 0xe1f   :  { %2420 = vmatmul.msk.f32.vlgmr.msrb.gmra.mxu0 %vm551_vm12, %v540_v24  ;;  %2424 = vmatmul.msk.f32.vlgmr.msrb.gmra.mxu1 %vm551_vm12, %v541_v25  ;;  %v3367_v25 = vld [vmem:[%s3889_s5] ss:$0 sm:$0xff] }
 0xe20   :  { %2433 = vmatpush.xpose.msk.msra.mxu0 %vm551_vm12, %v3128_v23  ;;  %2437 = vmatpush.xpose.msk.msra.mxu1 %vm551_vm12, %v3128_v23 }
 0xe21   :  { %2441 = vmatpush.xpose.msk.msra.mxu2 %vm551_vm12, %v3128_v23  ;;  %2445 = vmatpush.xpose.msk.msra.mxu3 %vm551_vm12, %v3128_v23 }
 0xe22   :  { %2428 = vmatmul.msk.f32.vlgmr.msrb.gmra.mxu2 %vm551_vm12, %v542_v26  ;;  %2432 = vmatmul.msk.f32.vlgmr.msrb.gmra.mxu3 %vm551_vm12, %v543_v27 }
 0xe24   :  { %2434 = vmatpush.xpose.msk.msra.mxu0 %vm551_vm12, %v3149_v28  ;;  %2438 = vmatpush.xpose.msk.msra.mxu1 %vm551_vm12, %v3149_v28 }
 0xe25   :  { %2442 = vmatpush.xpose.msk.msra.mxu2 %vm551_vm12, %v3149_v28  ;;  %2446 = vmatpush.xpose.msk.msra.mxu3 %vm551_vm12, %v3149_v28 }
 0xe28   :  { %2435 = vmatpush.xpose.msk.msra.mxu0 %vm551_vm12, %v3166_v29  ;;  %2439 = vmatpush.xpose.msk.msra.mxu1 %vm551_vm12, %v3166_v29 }
 0xe29   :  { %2443 = vmatpush.xpose.msk.msra.mxu2 %vm551_vm12, %v3166_v29  ;;  %2447 = vmatpush.xpose.msk.msra.mxu3 %vm551_vm12, %v3166_v29 }
 0xe2b   :  { %2436 = vmatmul.msk.f32.vlgmr.msra.gmra.mxu0 %vm551_vm12, %v496_v31  ;;  %2440 = vmatmul.msk.f32.vlgmr.msra.gmra.mxu1 %vm551_vm12, %v497_v32 }
 0xe2c   :  { %2449 = vmatpush.xpose.msk.msrb.mxu0 %vm551_vm12, %v3128_v23  ;;  %2453 = vmatpush.xpose.msk.msrb.mxu1 %vm551_vm12, %v3128_v23 }
 0xe2d   :  { %2457 = vmatpush.xpose.msk.msrb.mxu2 %vm551_vm12, %v3128_v23  ;;  %2461 = vmatpush.xpose.msk.msrb.mxu3 %vm551_vm12, %v3128_v23 }
 0xe2e   :  { %2444 = vmatmul.msk.f32.vlgmr.msra.gmra.mxu2 %vm551_vm12, %v498_v34  ;;  %2448 = vmatmul.msk.f32.vlgmr.msra.gmra.mxu3 %vm551_vm12, %v499_v35 }
 0xe30   :  { %2450 = vmatpush.xpose.msk.msrb.mxu0 %vm551_vm12, %v3149_v28  ;;  %2454 = vmatpush.xpose.msk.msrb.mxu1 %vm551_vm12, %v3149_v28 }
 0xe31   :  { %2458 = vmatpush.xpose.msk.msrb.mxu2 %vm551_vm12, %v3149_v28  ;;  %2462 = vmatpush.xpose.msk.msrb.mxu3 %vm551_vm12, %v3149_v28 }
 0xe34   :  { %2451 = vmatpush.xpose.msk.msrb.mxu0 %vm551_vm12, %v3166_v29  ;;  %2455 = vmatpush.xpose.msk.msrb.mxu1 %vm551_vm12, %v3166_v29 }
 0xe35   :  { %2459 = vmatpush.xpose.msk.msrb.mxu2 %vm551_vm12, %v3166_v29  ;;  %2463 = vmatpush.xpose.msk.msrb.mxu3 %vm551_vm12, %v3166_v29 }
 0xe37   :  { %2452 = vmatmul.msk.f32.vlgmr.msrb.gmra.mxu0 %vm551_vm12, %v500_v36  ;;  %2456 = vmatmul.msk.f32.vlgmr.msrb.gmra.mxu1 %vm551_vm12, %v501_v37 }
 0xe38   :  { %2465 = vmatpush.xpose.msk.msra.mxu0 %vm551_vm12, %v3128_v23  ;;  %2469 = vmatpush.xpose.msk.msra.mxu1 %vm551_vm12, %v3128_v23 }
 0xe39   :  { %2473 = vmatpush.xpose.msk.msra.mxu2 %vm551_vm12, %v3128_v23  ;;  %2477 = vmatpush.xpose.msk.msra.mxu3 %vm551_vm12, %v3128_v23 }
 0xe3a   :  { %2460 = vmatmul.msk.f32.vlgmr.msrb.gmra.mxu2 %vm551_vm12, %v502_v38  ;;  %2464 = vmatmul.msk.f32.vlgmr.msrb.gmra.mxu3 %vm551_vm12, %v503_v39 }
 0xe3c   :  { %2466 = vmatpush.xpose.msk.msra.mxu0 %vm551_vm12, %v3149_v28  ;;  %2470 = vmatpush.xpose.msk.msra.mxu1 %vm551_vm12, %v3149_v28 }
 0xe3d   :  { %2474 = vmatpush.xpose.msk.msra.mxu2 %vm551_vm12, %v3149_v28  ;;  %2478 = vmatpush.xpose.msk.msra.mxu3 %vm551_vm12, %v3149_v28 }
 0xe40   :  { %2467 = vmatpush.xpose.msk.msra.mxu0 %vm551_vm12, %v3166_v29  ;;  %2471 = vmatpush.xpose.msk.msra.mxu1 %vm551_vm12, %v3166_v29 }
 0xe41   :  { %2475 = vmatpush.xpose.msk.msra.mxu2 %vm551_vm12, %v3166_v29  ;;  %2479 = vmatpush.xpose.msk.msra.mxu3 %vm551_vm12, %v3166_v29 }
 0xe43   :  { %2468 = vmatmul.msk.f32.vlgmr.msra.gmra.mxu0 %vm551_vm12, %v504_v40  ;;  %2472 = vmatmul.msk.f32.vlgmr.msra.gmra.mxu1 %vm551_vm12, %v505_v41 }
 0xe44   :  { %2481 = vmatpush.xpose.msk.msrb.mxu0 %vm551_vm12, %v3128_v23  ;;  %2485 = vmatpush.xpose.msk.msrb.mxu1 %vm551_vm12, %v3128_v23 }
 0xe45   :  { %2489 = vmatpush.xpose.msk.msrb.mxu2 %vm551_vm12, %v3128_v23  ;;  %2493 = vmatpush.xpose.msk.msrb.mxu3 %vm551_vm12, %v3128_v23 }
 0xe46   :  { %2476 = vmatmul.msk.f32.vlgmr.msra.gmra.mxu2 %vm551_vm12, %v506_v42  ;;  %2480 = vmatmul.msk.f32.vlgmr.msra.gmra.mxu3 %vm551_vm12, %v507_v6 }
 0xe48   :  { %2482 = vmatpush.xpose.msk.msrb.mxu0 %vm551_vm12, %v3149_v28  ;;  %2486 = vmatpush.xpose.msk.msrb.mxu1 %vm551_vm12, %v3149_v28 }
 0xe49   :  { %2490 = vmatpush.xpose.msk.msrb.mxu2 %vm551_vm12, %v3149_v28  ;;  %2494 = vmatpush.xpose.msk.msrb.mxu3 %vm551_vm12, %v3149_v28 }
 0xe4c   :  { %2483 = vmatpush.xpose.msk.msrb.mxu0 %vm551_vm12, %v3166_v29  ;;  %2487 = vmatpush.xpose.msk.msrb.mxu1 %vm551_vm12, %v3166_v29 }
 0xe4d   :  { %2491 = vmatpush.xpose.msk.msrb.mxu2 %vm551_vm12, %v3166_v29  ;;  %2495 = vmatpush.xpose.msk.msrb.mxu3 %vm551_vm12, %v3166_v29 }
 0xe4f   :  { %2484 = vmatmul.msk.f32.vlgmr.msrb.gmra.mxu0 %vm551_vm12, %v3260_v43  ;;  %2488 = vmatmul.msk.f32.vlgmr.msrb.gmra.mxu1 %vm551_vm12, %v509_v44 }
 0xe50   :  { %2497 = vmatpush.xpose.msk.msra.mxu0 %vm551_vm12, %v3128_v23  ;;  %2501 = vmatpush.xpose.msk.msra.mxu1 %vm551_vm12, %v3128_v23 }
 0xe51   :  { %2505 = vmatpush.xpose.msk.msra.mxu2 %vm551_vm12, %v3128_v23  ;;  %2509 = vmatpush.xpose.msk.msra.mxu3 %vm551_vm12, %v3128_v23 }
 0xe52   :  { %2492 = vmatmul.msk.f32.vlgmr.msrb.gmra.mxu2 %vm551_vm12, %v510_v45  ;;  %2496 = vmatmul.msk.f32.vlgmr.msrb.gmra.mxu3 %vm551_vm12, %v511_v33 }
 0xe54   :  { %2498 = vmatpush.xpose.msk.msra.mxu0 %vm551_vm12, %v3149_v28  ;;  %2502 = vmatpush.xpose.msk.msra.mxu1 %vm551_vm12, %v3149_v28 }
 0xe55   :  { %2506 = vmatpush.xpose.msk.msra.mxu2 %vm551_vm12, %v3149_v28  ;;  %2510 = vmatpush.xpose.msk.msra.mxu3 %vm551_vm12, %v3149_v28 }
 0xe58   :  { %2499 = vmatpush.xpose.msk.msra.mxu0 %vm551_vm12, %v3166_v29  ;;  %2503 = vmatpush.xpose.msk.msra.mxu1 %vm551_vm12, %v3166_v29 }
 0xe59   :  { %2507 = vmatpush.xpose.msk.msra.mxu2 %vm551_vm12, %v3166_v29  ;;  %2511 = vmatpush.xpose.msk.msra.mxu3 %vm551_vm12, %v3166_v29 }
 0xe5b   :  { %2500 = vmatmul.msk.f32.vlgmr.msra.gmra.mxu0 %vm551_vm12, %v512_v46  ;;  %2504 = vmatmul.msk.f32.vlgmr.msra.gmra.mxu1 %vm551_vm12, %v513_v47 }
 0xe5c   :  { %2513 = vmatpush.xpose.msk.msrb.mxu0 %vm551_vm12, %v3128_v23  ;;  %2517 = vmatpush.xpose.msk.msrb.mxu1 %vm551_vm12, %v3128_v23 }
 0xe5d   :  { %2521 = vmatpush.xpose.msk.msrb.mxu2 %vm551_vm12, %v3128_v23  ;;  %2525 = vmatpush.xpose.msk.msrb.mxu3 %vm551_vm12, %v3128_v23 }
 0xe5e   :  { %2508 = vmatmul.msk.f32.vlgmr.msra.gmra.mxu2 %vm551_vm12, %v3295_v48  ;;  %2512 = vmatmul.msk.f32.vlgmr.msra.gmra.mxu3 %vm551_vm12, %v3297_v49 }
 0xe60   :  { %2514 = vmatpush.xpose.msk.msrb.mxu0 %vm551_vm12, %v3149_v28  ;;  %2518 = vmatpush.xpose.msk.msrb.mxu1 %vm551_vm12, %v3149_v28 }
 0xe61   :  { %2522 = vmatpush.xpose.msk.msrb.mxu2 %vm551_vm12, %v3149_v28  ;;  %2526 = vmatpush.xpose.msk.msrb.mxu3 %vm551_vm12, %v3149_v28 }
 0xe64   :  { %2515 = vmatpush.xpose.msk.msrb.mxu0 %vm551_vm12, %v3166_v29  ;;  %2519 = vmatpush.xpose.msk.msrb.mxu1 %vm551_vm12, %v3166_v29 }
 0xe65   :  { %2523 = vmatpush.xpose.msk.msrb.mxu2 %vm551_vm12, %v3166_v29  ;;  %2527 = vmatpush.xpose.msk.msrb.mxu3 %vm551_vm12, %v3166_v29 }
 0xe67   :  { %2516 = vmatmul.msk.f32.vlgmr.msrb.gmra.mxu0 %vm551_vm12, %v516_v50  ;;  %2520 = vmatmul.msk.f32.vlgmr.msrb.gmra.mxu1 %vm551_vm12, %v517_v51 }
 0xe68   :  { %2524 = vmatmul.msk.f32.vlgmr.msrb.gmra.mxu2 %vm551_vm12, %v518_v52  ;;  %2528 = vmatmul.msk.f32.vlgmr.msrb.gmra.mxu3 %vm551_vm12, %v519_v53 }
 0xe6b   :  { %v581_v54 = vpop.f32.mrf.mxu0  ;;  %v604_v55 = vpop.f32.mrf.mxu1 }
 0xe72   :  { %v627_v56 = vpop.f32.mrf.mxu2  ;;  %v650_v61 = vpop.f32.mrf.mxu3 }
 0xe73   :  { %v673_v57 = vpop.f32.mrf.mxu0  ;;  %v696_v58 = vpop.f32.mrf.mxu1 }
 0xe7a   :  { %v719_v59 = vpop.f32.mrf.mxu2  ;;  %v742_v60 = vpop.f32.mrf.mxu3 }
 0xe7b   :  { %v765_v62 = vpop.f32.mrf.mxu0  ;;  %v788_v63 = vpop.f32.mrf.mxu1 }
 0xe82   :  { %v3329_v30 = vpop.f32.mrf.mxu2  ;;  %v3331_v0 = vpop.f32.mrf.mxu3 }
 0xe84   :  { %v3333_v1 = vpop.f32.mrf.mxu0  ;;  %v3335_v2 = vpop.f32.mrf.mxu1 }
 0xe8d   :  { %v3337_v3 = vpop.f32.mrf.mxu2  ;;  %v3339_v4 = vpop.f32.mrf.mxu3 }
 0xe90   :  { %v3341_v5 = vpop.f32.mrf.mxu0  ;;  %v3343_v7 = vpop.f32.mrf.mxu1 }
 0xe99   :  { %v3345_v8 = vpop.f32.mrf.mxu2  ;;  %v3347_v9 = vpop.f32.mrf.mxu3 }
 0xe9c   :  { %v3349_v10 = vpop.f32.mrf.mxu0  ;;  %v3351_v11 = vpop.f32.mrf.mxu1 }
 0xea5   :  { %v3353_v12 = vpop.f32.mrf.mxu2  ;;  %v3355_v13 = vpop.f32.mrf.mxu3 }
 0xea8   :  { %v1142_v15 = vpop.f32.mrf.mxu0  ;;  %v1165_v16 = vpop.f32.mrf.mxu1 }
 0xea9   :  { %v1143_v17 = vadd.f32 %v1142_v15, %v581_v54  ;;  %v1166_v18 = vadd.f32 %v1165_v16, %v604_v55 }
 0xeab   :  { %v1678_v19 = vadd.f32 %v3360_v14, %v1143_v17  ;;  %v1679_v20 = vadd.f32 %v3360_v14, %v1166_v18 }
 0xead   :  { %2593 = vtanh.f32 %v1678_v19 }
 0xeae   :  { %2595 = vtanh.f32 %v1679_v20 }
 0xeb1   :  { %v1188_v21 = vpop.f32.mrf.mxu2  ;;  %v1211_v22 = vpop.f32.mrf.mxu3 }
 0xeb2   :  { %v1189_v23 = vadd.f32 %v1188_v21, %v627_v56  ;;  %v1212_v24 = vadd.f32 %v1211_v22, %v650_v61 }
 0xeb3   :  { %v2594_v29 = vpop.eup %2593 }
 0xeb4   :  { %v1680_v26 = vadd.f32 %v3360_v14, %v1189_v23  ;;  %v1234_v27 = vpop.f32.mrf.mxu0  ;;  %v1257_v28 = vpop.f32.mrf.mxu1  ;;  %v1681_v34 = vadd.f32 %v3360_v14, %v1212_v24  ;;  %v1730_v35 = vmul.f32 %v2594_v29, %v3367_v25 }
 0xeb5   :  { %v1235_v31 = vadd.f32 %v1234_v27, %v673_v57  ;;  %v1258_v32 = vadd.f32 %v1257_v28, %v696_v58  ;;  %v2596_v38 = vpop.eup %2595 }
 0xeb6   :  { %2597 = vtanh.f32 %v1680_v26  ;;  %v1755_v37 = vsel %vm1754_vm13, %v1730_v35, 0.0  ;;  %v1731_v45 = vmul.f32 %v2596_v38, %v3367_v25 }
 0xeb7   :  { %v1682_v36 = vadd.f32 %v3360_v14, %v1235_v31  ;;  %v1683_v39 = vadd.f32 %v3360_v14, %v1258_v32  ;;  %1756 = vadd.xlane.f32.xlu0 %v1755_v37 }
 0xeb8   :  { %v1758_v61 = vsel %vm1754_vm13, %v1731_v45, 0.0 }
 0xeb9   :  { %2599 = vtanh.f32 %v1682_v36 }
 0xeba   :  { %2601 = vtanh.f32 %v1681_v34 }
 0xebb   :  { %2603 = vtanh.f32 %v1683_v39 }
 0xebc   :  { %v2598_v42 = vpop.eup %2597 }
 0xebd   :  { %v1280_v40 = vpop.f32.mrf.mxu2  ;;  %v1303_v41 = vpop.f32.mrf.mxu3  ;;  %v1732_v33 = vmul.f32 %v2598_v42, %v3367_v25 }
 0xebe   :  { %v1281_v6 = vadd.f32 %v1280_v40, %v719_v59  ;;  %v1304_v44 = vadd.f32 %v1303_v41, %v742_v60 }
 0xebf   :  { %v2600_v52 = vpop.eup %2599  ;;  %v1761_v55 = vsel %vm1754_vm13, %v1732_v33, 0.0  ;;  %1759 = vadd.xlane.f32.xlu0 %v1758_v61 }
 0xec0   :  { %v1684_v46 = vadd.f32 %v3360_v14, %v1281_v6  ;;  %v1685_v47 = vadd.f32 %v3360_v14, %v1304_v44  ;;  %v1326_v50 = vpop.f32.mrf.mxu0  ;;  %v1349_v51 = vpop.f32.mrf.mxu1  ;;  %1762 = vadd.xlane.f32.xlu1 %v1761_v55  ;;  %v1734_v57 = vmul.f32 %v2600_v52, %v3367_v25 }
 0xec1   :  { %v1327_v53 = vadd.f32 %v1326_v50, %v765_v62  ;;  %v1350_v54 = vadd.f32 %v1349_v51, %v788_v63  ;;  %v2602_v56 = vpop.eup %2601 }
 0xec2   :  { %2605 = vtanh.f32 %v1684_v46  ;;  %v1767_v60 = vsel %vm1754_vm13, %v1734_v57, 0.0  ;;  %v2604_v15 = vpop.eup %2603  ;;  %v1733_v62 = vmul.f32 %v2602_v56, %v3367_v25 }
 0xec3   :  { %v1686_v58 = vadd.f32 %v3360_v14, %v1327_v53  ;;  %v1687_v59 = vadd.f32 %v3360_v14, %v1350_v54  ;;  %2607 = vtanh.f32 %v1685_v47  ;;  %1768 = vadd.xlane.f32.xlu2 %v1767_v60  ;;  %v1735_v20 = vmul.f32 %v2604_v15, %v3367_v25 }
 0xec4   :  { %v1764_v21 = vsel %vm1754_vm13, %v1733_v62, 0.0 }
 0xec5   :  { %2609 = vtanh.f32 %v1687_v59  ;;  %v1770_v32 = vsel %vm1754_vm13, %v1735_v20, 0.0 }
 0xec6   :  { %2611 = vtanh.f32 %v1686_v58 }
 0xec8   :  { %v2606_v17 = vpop.eup %2605  ;;  %1765 = vadd.xlane.f32.xlu1 %v1764_v21 }
 0xec9   :  { %v1372_v63 = vpop.f32.mrf.mxu2  ;;  %v1395_v16 = vpop.f32.mrf.mxu3  ;;  %v1736_v22 = vmul.f32 %v2606_v17, %v3367_v25 }
 0xeca   :  { %v1373_v18 = vadd.f32 %v1372_v63, %v3329_v30  ;;  %v1396_v19 = vadd.f32 %v1395_v16, %v3331_v0  ;;  %v2608_v23 = vpop.eup %2607 }
 0xecb   :  { %v1773_v30 = vsel %vm1754_vm13, %v1736_v22, 0.0  ;;  %v2610_v31 = vpop.eup %2609  ;;  %1771 = vadd.xlane.f32.xlu2 %v1770_v32  ;;  %v1737_v36 = vmul.f32 %v2608_v23, %v3367_v25 }
 0xecc   :  { %v1688_v24 = vadd.f32 %v3360_v14, %v1373_v18  ;;  %v1689_v26 = vadd.f32 %v3360_v14, %v1396_v19  ;;  %v1418_v27 = vpop.f32.mrf.mxu0  ;;  %v1441_v28 = vpop.f32.mrf.mxu1  ;;  %1774 = vadd.xlane.f32.xlu0 %v1773_v30  ;;  %v1739_v37 = vmul.f32 %v2610_v31, %v3367_v25 }
 0xecd   :  { %v1419_v29 = vadd.f32 %v1418_v27, %v3333_v1  ;;  %v1442_v0 = vadd.f32 %v1441_v28, %v3335_v2  ;;  %v2612_v34 = vpop.eup %2611  ;;  %v1776_v2 = vsel %vm1754_vm13, %v1737_v36, 0.0 }
 0xece   :  { %2613 = vtanh.f32 %v1688_v24  ;;  %v1738_v38 = vmul.f32 %v2612_v34, %v3367_v25  ;;  %v1782_v44 = vsel %vm1754_vm13, %v1739_v37, 0.0 }
 0xecf   :  { %v1690_v35 = vadd.f32 %v3360_v14, %v1419_v29  ;;  %2615 = vtanh.f32 %v1689_v26  ;;  %v1691_v1 = vadd.f32 %v3360_v14, %v1442_v0 }
 0xed0   :  { %1777 = vadd.xlane.f32.xlu1 %v1776_v2  ;;  %v1779_v51 = vsel %vm1754_vm13, %v1738_v38, 0.0 }
 0xed1   :  { %2617 = vtanh.f32 %v1690_v35 }
 0xed2   :  { %2619 = vtanh.f32 %v1691_v1 }
 0xed3   :  { %1780 = vadd.xlane.f32.xlu2 %v1779_v51 }
 0xed4   :  { %v2614_v41 = vpop.eup %2613  ;;  %1783 = vadd.xlane.f32.xlu0 %v1782_v44 }
 0xed5   :  { %v1464_v39 = vpop.f32.mrf.mxu2  ;;  %v1487_v40 = vpop.f32.mrf.mxu3 }
 0xed6   :  { %v1465_v42 = vadd.f32 %v1464_v39, %v3337_v3  ;;  %v1488_v6 = vadd.f32 %v1487_v40, %v3339_v4  ;;  %v2616_v45 = vpop.eup %2615  ;;  %v1740_v3 = vmul.f32 %v2614_v41, %v3367_v25 }
 0xed7   :  { %v2618_v52 = vpop.eup %2617  ;;  %v1741_v56 = vmul.f32 %v2616_v45, %v3367_v25 }
 0xed8   :  { %v1692_v33 = vadd.f32 %v3360_v14, %v1465_v42  ;;  %v1693_v46 = vadd.f32 %v3360_v14, %v1488_v6  ;;  %v1510_v47 = vpop.f32.mrf.mxu0  ;;  %v1533_v50 = vpop.f32.mrf.mxu1  ;;  %v1742_v54 = vmul.f32 %v2618_v52, %v3367_v25  ;;  %v1785_v61 = vsel %vm1754_vm13, %v1740_v3, 0.0 }
 0xed9   :  { %v1511_v53 = vadd.f32 %v1510_v47, %v3341_v5  ;;  %v1534_v4 = vadd.f32 %v1533_v50, %v3343_v7  ;;  %v2620_v57 = vpop.eup %2619  ;;  %1786 = vadd.xlane.f32.xlu1 %v1785_v61  ;;  %v1788_v63 = vsel %vm1754_vm13, %v1741_v56, 0.0 }
 0xeda   :  { %2621 = vtanh.f32 %v1692_v33  ;;  %v1791_v60 = vsel %vm1754_vm13, %v1742_v54, 0.0  ;;  %v1743_v19 = vmul.f32 %v2620_v57, %v3367_v25 }
 0xedb   :  { %2623 = vtanh.f32 %v1693_v46  ;;  %v1694_v55 = vadd.f32 %v3360_v14, %v1511_v53  ;;  %v1695_v58 = vadd.f32 %v3360_v14, %v1534_v4  ;;  %1789 = vadd.xlane.f32.xlu2 %v1788_v63 }
 0xedc   :  { %1792 = vadd.xlane.f32.xlu0 %v1791_v60  ;;  %v1794_v24 = vsel %vm1754_vm13, %v1743_v19, 0.0 }
 0xedd   :  { %2625 = vtanh.f32 %v1694_v55 }
 0xede   :  { %2627 = vtanh.f32 %v1695_v58 }
 0xee0   :  { %v2622_v15 = vpop.eup %2621 }
 0xee1   :  { %v1556_v5 = vpop.f32.mrf.mxu2  ;;  %v1579_v59 = vpop.f32.mrf.mxu3  ;;  %v1744_v23 = vmul.f32 %v2622_v15, %v3367_v25  ;;  %1795 = vadd.xlane.f32.xlu1 %v1794_v24 }
 0xee2   :  { %v1557_v7 = vadd.f32 %v1556_v5, %v3345_v8  ;;  %v1580_v62 = vadd.f32 %v1579_v59, %v3347_v9  ;;  %v2624_v16 = vpop.eup %2623 }
 0xee3   :  { %v1745_v8 = vmul.f32 %v2624_v16, %v3367_v25  ;;  %v2626_v26 = vpop.eup %2625  ;;  %v1797_v30 = vsel %vm1754_vm13, %v1744_v23, 0.0 }
 0xee4   :  { %v1602_v17 = vpop.f32.mrf.mxu0  ;;  %v1625_v18 = vpop.f32.mrf.mxu1  ;;  %v1696_v20 = vadd.f32 %v3360_v14, %v1557_v7  ;;  %v1697_v9 = vadd.f32 %v3360_v14, %v1580_v62  ;;  %1798 = vadd.xlane.f32.xlu2 %v1797_v30  ;;  %v1746_v34 = vmul.f32 %v2626_v26, %v3367_v25 }
 0xee5   :  { %v1626_v21 = vadd.f32 %v1625_v18, %v3351_v11  ;;  %v1603_v22 = vadd.f32 %v1602_v17, %v3349_v10  ;;  %v1800_v11 = vsel %vm1754_vm13, %v1745_v8, 0.0  ;;  %v2628_v31 = vpop.eup %2627 }
 0xee6   :  { %2629 = vtanh.f32 %v1696_v20  ;;  %1801 = vadd.xlane.f32.xlu0 %v1800_v11  ;;  %v1747_v38 = vmul.f32 %v2628_v31, %v3367_v25  ;;  %v1803_v39 = vsel %vm1754_vm13, %v1746_v34, 0.0 }
 0xee7   :  { %v1699_v27 = vadd.f32 %v3360_v14, %v1626_v21  ;;  %v1698_v28 = vadd.f32 %v3360_v14, %v1603_v22  ;;  %2631 = vtanh.f32 %v1697_v9 }
 0xee8   :  { %v1806_v2 = vsel %vm1754_vm13, %v1747_v38, 0.0 }
 0xee9   :  { %2633 = vtanh.f32 %v1699_v27  ;;  %1804 = vadd.xlane.f32.xlu1 %v1803_v39 }
 0xeea   :  { %2635 = vtanh.f32 %v1698_v28 }
 0xeeb   :  { %v1648_v29 = vpop.f32.mrf.mxu2  ;;  %v1671_v10 = vpop.f32.mrf.mxu3 }
 0xeec   :  { %v1649_v0 = vadd.f32 %v1648_v29, %v3353_v12  ;;  %v1672_v32 = vadd.f32 %v1671_v10, %v3355_v13  ;;  %v2630_v35 = vpop.eup %2629  ;;  %1807 = vadd.xlane.f32.xlu2 %v1806_v2 }
 0xeed   :  { %v1748_v1 = vmul.f32 %v2630_v35, %v3367_v25  ;;  %v2632_v12 = vpop.eup %2631 }
 0xeee   :  { %v1700_v36 = vadd.f32 %v3360_v14, %v1649_v0  ;;  %v1701_v37 = vadd.f32 %v3360_v14, %v1672_v32  ;;  %v1749_v14 = vmul.f32 %v2632_v12, %v3367_v25 }
 0xeef   :  { %v1809_v13 = vsel %vm1754_vm13, %v1748_v1, 0.0  ;;  %v2634_v40 = vpop.eup %2633 }
 0xef0   :  { %2637 = vtanh.f32 %v1700_v36  ;;  %1810 = vadd.xlane.f32.xlu0 %v1809_v13  ;;  %v2636_v41 = vpop.eup %2635  ;;  %v1751_v6 = vmul.f32 %v2634_v40, %v3367_v25  ;;  %v1812_v46 = vsel %vm1754_vm13, %v1749_v14, 0.0 }
 0xef1   :  { %2639 = vtanh.f32 %v1701_v37  ;;  %v1750_v45 = vmul.f32 %v2636_v41, %v3367_v25  ;;  %1813 = vadd.xlane.f32.xlu1 %v1812_v46 }
 0xef2   :  { %v1818_v50 = vsel %vm1754_vm13, %v1751_v6, 0.0 }
 0xef3   :  { %v1815_v52 = vsel %vm1754_vm13, %v1750_v45, 0.0 }
 0xef4   :  { %1816 = vadd.xlane.f32.xlu2 %v1815_v52 }
 0xef6   :  { %v2638_v42 = vpop.eup %2637 }
 0xef7   :  { %v2640_v44 = vpop.eup %2639  ;;  %v1752_v33 = vmul.f32 %v2638_v42, %v3367_v25 }
 0xef8   :  { %v1753_v47 = vmul.f32 %v2640_v44, %v3367_v25  ;;  %1819 = vadd.xlane.f32.xlu0 %v1818_v50 }
 0xef9   :  { %v1821_v53 = vsel %vm1754_vm13, %v1752_v33, 0.0 }
 0xefa   :  { %v1824_v51 = vsel %vm1754_vm13, %v1753_v47, 0.0  ;;  %1822 = vadd.xlane.f32.xlu1 %v1821_v53 }
 0xefc   :  { %1825 = vadd.xlane.f32.xlu2 %v1824_v51 }
 0xf2a   :  { %v1757_v3 = vpop.xlane.xlu0 %1756 }
 0xf2b   :  { %v1828_v17 = vsel %vm1827_vm14, %v1757_v3, -inf }
 0xf32   :  { %v3455_v54 = vpop.xlane.xlu0 %1759 }
 0xf33   :  { %v3453_v4 = vpop.xlane.xlu1 %1762  ;;  %v1835_v26 = vsel %vm1827_vm14, %v3455_v54, -inf }
 0xf34   :  { %v1842_v24 = vsel %vm1827_vm14, %v3453_v4, -inf }
 0xf36   :  { %v3457_v55 = vpop.xlane.xlu2 %1768 }
 0xf37   :  { %v3493_v27 = vsel %vm1827_vm14, %v3457_v55, -inf }
 0xf3b   :  { %v3459_v25 = vpop.xlane.xlu1 %1765 }
 0xf3c   :  { %v1849_v35 = vsel %vm1827_vm14, %v3459_v25, -inf }
 0xf3e   :  { %v3461_v61 = vpop.xlane.xlu2 %1771 }
 0xf3f   :  { %v1775_v56 = vpop.xlane.xlu0 %1774 }
 0xf40   :  { %v1829_v16 = vsel %vm1827_vm14, %v1775_v56, -inf }
 0xf41   :  { %v1830_v19 = vmax.f32 %v1828_v17, %v1829_v16 }
 0xf43   :  { %v3463_v57 = vpop.xlane.xlu1 %1777 }
 0xf44   :  { %v1836_v21 = vsel %vm1827_vm14, %v3463_v57, -inf }
 0xf45   :  { %v1837_v11 = vmax.f32 %v1835_v26, %v1836_v21 }
 0xf46   :  { %v3467_v5 = vpop.xlane.xlu2 %1780 }
 0xf47   :  { %v3465_v58 = vpop.xlane.xlu0 %1783  ;;  %v1843_v10 = vsel %vm1827_vm14, %v3467_v5, -inf }
 0xf48   :  { %v1850_v29 = vsel %vm1827_vm14, %v3465_v58, -inf  ;;  %v1844_v41 = vmax.f32 %v1842_v24, %v1843_v10 }
 0xf49   :  { %v1851_v2 = vmax.f32 %v1849_v35, %v1850_v29 }
 0xf4c   :  { %v3469_v59 = vpop.xlane.xlu1 %1786 }
 0xf4d   :  { %v3504_v36 = vsel %vm1827_vm14, %v3469_v59, -inf }
 0xf4e   :  { %v3471_v15 = vpop.xlane.xlu2 %1789  ;;  %v1858_v6 = vmax.f32 %v3493_v27, %v3504_v36 }
 0xf4f   :  { %v1793_v60 = vpop.xlane.xlu0 %1792  ;;  %v1864_v36 = vsel %vm1827_vm14, %v3471_v15, -inf }
 0xf50   :  { %v1831_v18 = vsel %vm1827_vm14, %v1793_v60, -inf }
 0xf51   :  { %v1832_v22 = vmax.f32 %v1830_v19, %v1831_v18 }
 0xf54   :  { %v1796_v7 = vpop.xlane.xlu1 %1795 }
 0xf55   :  { %v1838_v30 = vsel %vm1827_vm14, %v1796_v7, -inf }
 0xf56   :  { %v1839_v38 = vmax.f32 %v1837_v11, %v1838_v30 }
 0xf57   :  { %v3475_v63 = vpop.xlane.xlu2 %1798 }
 0xf58   :  { %v1845_v1 = vsel %vm1827_vm14, %v3475_v63, -inf }
 0xf59   :  { %v3473_v62 = vpop.xlane.xlu0 %1801  ;;  %v1846_v46 = vmax.f32 %v1844_v41, %v1845_v1 }
 0xf5a   :  { %v1852_v37 = vsel %vm1827_vm14, %v3473_v62, -inf }
 0xf5b   :  { %v1853_v33 = vmax.f32 %v1851_v2, %v1852_v37 }
 0xf5c   :  { %v3480_v20 = vpop.xlane.xlu1 %1804 }
 0xf5f   :  { %v3485_v23 = vpop.xlane.xlu2 %1807 }
 0xf63   :  { %v1811_v8 = vpop.xlane.xlu0 %1810 }
 0xf64   :  { %v1833_v9 = vsel %vm1827_vm14, %v1811_v8, -inf  ;;  %v1814_v40 = vpop.xlane.xlu1 %1813 }
 0xf65   :  { %v1834_v28 = vmax.f32 %v1832_v22, %v1833_v9  ;;  %v1840_v42 = vsel %vm1827_vm14, %v1814_v40, -inf }
 0xf66   :  { %v1841_v44 = vmax.f32 %v1839_v38, %v1840_v42 }
 0xf67   :  { %v1870_v31 = vsub.f32 %v1757_v3, %v1834_v28  ;;  %v1876_v0 = vsub.f32 %v1775_v56, %v1834_v28  ;;  %v1882_v32 = vsub.f32 %v1793_v60, %v1834_v28  ;;  %v1888_v34 = vsub.f32 %v1811_v8, %v1834_v28  ;;  %v1817_v50 = vpop.xlane.xlu2 %1816 }
 0xf68   :  { %v1871_v51 = vsub.f32 %v3455_v54, %v1841_v44  ;;  %v1877_v52 = vsub.f32 %v3463_v57, %v1841_v44  ;;  %v1883_v53 = vsub.f32 %v1796_v7, %v1841_v44  ;;  %v1889_v3 = vsub.f32 %v1814_v40, %v1841_v44 }
 0xf69   :  { %v1894_v39 = vmul.f32 1.442695, %v1870_v31  ;;  %v1906_v12 = vmul.f32 1.442695, %v1876_v0  ;;  %v1918_v13 = vmul.f32 1.442695, %v1882_v32 }
 0xf6a   :  { %v1930_v14 = vmul.f32 1.442695, %v1888_v34  ;;  %v1847_v60 = vsel %vm1827_vm14, %v1817_v50, -inf  ;;  %v1896_v16 = vmul.f32 1.442695, %v1871_v51  ;;  %v1859_v57 = vsel %vm1827_vm14, %v3480_v20, -inf }
 0xf6b   :  { %2641 = vpow2.f32 %v1894_v39  ;;  %v1820_v45 = vpop.xlane.xlu0 %1819  ;;  %v1908_v17 = vmul.f32 1.442695, %v1877_v52  ;;  %v1920_v18 = vmul.f32 1.442695, %v1883_v53  ;;  %v1848_v19 = vmax.f32 %v1846_v46, %v1847_v60 }
 0xf6c   :  { %2643 = vpow2.f32 %v1906_v12  ;;  %v1854_v47 = vsel %vm1827_vm14, %v1820_v45, -inf  ;;  %v1932_v21 = vmul.f32 1.442695, %v1889_v3  ;;  %v1860_v37 = vmax.f32 %v1858_v6, %v1859_v57 }
 0xf6d   :  { %2645 = vpow2.f32 %v1918_v13  ;;  %v1855_v56 = vmax.f32 %v1853_v33, %v1854_v47  ;;  %v1872_v24 = vsub.f32 %v3453_v4, %v1848_v19  ;;  %v1878_v29 = vsub.f32 %v3467_v5, %v1848_v19  ;;  %v3537_v0 = vpop.xlane.xlu1 %1822 }
 0xf6e   :  { %2647 = vpow2.f32 %v1930_v14  ;;  %v1884_v31 = vsub.f32 %v3475_v63, %v1848_v19  ;;  %v1890_v34 = vsub.f32 %v1817_v50, %v1848_v19  ;;  %v1861_v39 = vsel %vm1827_vm14, %v3537_v0, -inf }
 0xf6f   :  { %v1873_v22 = vsub.f32 %v3459_v25, %v1855_v56  ;;  %v1879_v8 = vsub.f32 %v3465_v58, %v1855_v56  ;;  %v1885_v9 = vsub.f32 %v3473_v62, %v1855_v56  ;;  %2649 = vpow2.f32 %v1896_v16 }
 0xf70   :  { %v1891_v7 = vsub.f32 %v1820_v45, %v1855_v56  ;;  %2651 = vpow2.f32 %v1908_v17  ;;  %v1898_v35 = vmul.f32 1.442695, %v1872_v24  ;;  %v1910_v63 = vmul.f32 1.442695, %v1878_v29 }
 0xf71   :  { %v3520_v54 = vpop.eup %2641  ;;  %v1900_v25 = vmul.f32 1.442695, %v1873_v22  ;;  %v1912_v28 = vmul.f32 1.442695, %v1879_v8  ;;  %2653 = vpow2.f32 %v1920_v18  ;;  %v1924_v11 = vmul.f32 1.442695, %v1885_v9 }
 0xf72   :  { %v3525_v26 = vpop.eup %2643  ;;  %v1942_v27 = vsel %vm1827_vm14, %v3520_v54, 0.0  ;;  %2655 = vpow2.f32 %v1932_v21  ;;  %v1936_v30 = vmul.f32 1.442695, %v1891_v7  ;;  %v1922_v2 = vmul.f32 1.442695, %v1884_v31 }
 0xf73   :  { %v3529_v58 = vpop.eup %2645  ;;  %v1943_v62 = vsel %vm1827_vm14, %v3525_v26, 0.0  ;;  %2657 = vpow2.f32 %v1900_v25  ;;  %v1934_v42 = vmul.f32 1.442695, %v1890_v34  ;;  %v1863_v44 = vsel %vm1827_vm14, %v3461_v61, -inf }
 0xf74   :  { %v3534_v10 = vpop.eup %2647  ;;  %v1944_v4 = vadd.f32 %v1943_v62, %v1942_v27  ;;  %v1945_v32 = vsel %vm1827_vm14, %v3529_v58, 0.0  ;;  %2659 = vpow2.f32 %v1912_v28  ;;  %v3564_v45 = vmax.f32 %v1860_v37, %v1861_v39 }
 0xf75   :  { %v3543_v1 = vpop.eup %2649  ;;  %v1947_v38 = vsel %vm1827_vm14, %v3534_v10, 0.0  ;;  %2661 = vpow2.f32 %v1924_v11  ;;  %v1865_v46 = vmax.f32 %v1863_v44, %v1864_v36  ;;  %v1866_v51 = vsel %vm1827_vm14, %v3485_v23, -inf }
 0xf76   :  { %v1946_v5 = vadd.f32 %v1945_v32, %v1944_v4  ;;  %v3549_v12 = vpop.eup %2651  ;;  %v1949_v40 = vsel %vm1827_vm14, %v3543_v1, 0.0  ;;  %2663 = vpow2.f32 %v1936_v30  ;;  %v1874_v21 = vsub.f32 %v3457_v55, %v3564_v45 }
 0xf77   :  { %v3555_v41 = vpop.eup %2653  ;;  %v1950_v14 = vsel %vm1827_vm14, %v3549_v12, 0.0  ;;  %2665 = vpow2.f32 %v1898_v35  ;;  %v1880_v22 = vsub.f32 %v3469_v59, %v3564_v45  ;;  %v1867_v57 = vmax.f32 %v1865_v46, %v1866_v51 }
 0xf78   :  { %v3551_v13 = vadd.f32 %v1947_v38, %v1946_v5  ;;  %v3559_v6 = vpop.eup %2655  ;;  %v1951_v47 = vadd.f32 %v1950_v14, %v1949_v40  ;;  %v1952_v52 = vsel %vm1827_vm14, %v3555_v41, 0.0  ;;  %v1886_v59 = vsub.f32 %v3480_v20, %v3564_v45  ;;  %v3625_v40 = vpop.xlane.xlu2 %1825 }
 0xf79   :  { %v3566_v33 = vpop.eup %2657  ;;  %v1954_v18 = vsel %vm1827_vm14, %v3559_v6, 0.0  ;;  %v1902_v32 = vmul.f32 1.442695, %v1874_v21  ;;  %v1914_v5 = vmul.f32 1.442695, %v1880_v22 }
 0xf7a   :  { %2667 = vrcp.f32 %v3551_v13  ;;  %v3568_v50 = vpop.eup %2659  ;;  %v1963_v53 = vsel %vm1827_vm14, %v3566_v33, 0.0  ;;  %v1993_v56 = vand.u32 2147483647, %v3551_v13  ;;  %v1953_v60 = vadd.f32 %v1952_v52, %v1951_v47 }
 0xf7b   :  { %2669 = vpow2.f32 %v1910_v63  ;;  %v3576_v3 = vpop.eup %2661  ;;  %v1964_v16 = vsel %vm1827_vm14, %v3568_v50, 0.0  ;;  %v1995_v9 = vand.u32 2147483648, %v3551_v13  ;;  %vm1989_vm15 = vweird.f32 %v3551_v13 }
 0xf7c   :  { %2671 = vpow2.f32 %v1922_v2  ;;  %v3581_v17 = vpop.eup %2663  ;;  %v1965_v19 = vadd.f32 %v1964_v16, %v1963_v53  ;;  %v3592_v7 = vadd.f32 %v1954_v18, %v1953_v60  ;;  %v1966_v24 = vsel %vm1827_vm14, %v3576_v3, 0.0 }
 0xf7d   :  { %2673 = vpow2.f32 %v1934_v42  ;;  %v3589_v8 = vpop.eup %2665  ;;  %vm3604_vm0 = vcmp.eq.f32.partialorder %v1993_v56, 8.507059e+37  ;;  %v1968_v29 = vsel %vm1827_vm14, %v3581_v17, 0.0  ;;  %v1996_v36 = vor.u32 1.1754944e-38, %v1995_v9 }
 0xf7e   :  { %v1967_v25 = vadd.f32 %v1966_v24, %v1965_v19  ;;  %v1956_v55 = vsel %vm1827_vm14, %v3589_v8, 0.0  ;;  %2675 = vrcp.f32 %v3592_v7  ;;  %v2010_v30 = vand.u32 2147483648, %v3592_v7 }
 0xf7f   :  { %v1892_v63 = vsub.f32 %v3537_v0, %v3564_v45  ;;  %v1926_v39 = vmul.f32 1.442695, %v1886_v59  ;;  %v2008_v44 = vand.u32 2147483647, %v3592_v7  ;;  %v1868_v45 = vsel %vm1827_vm14, %v3625_v40, -inf }
 0xf80   :  { %v2668_v27 = vpop.eup %2667  ;;  %v3614_v31 = vadd.f32 %v1968_v29, %v1967_v25  ;;  %v3629_v46 = vor.u32 1.1754944e-38, %v2010_v30  ;;  %vm2004_vm4 = vweird.f32 %v3592_v7  ;;  %v3654_v9 = vmax.f32 %v1867_v57, %v1868_v45  ;;  %v2702_v30 = vld [vmem:[#allocation2 + $0xc] sm:$0x3] }
 0xf81   :  { %v3601_v28 = vpop.eup %2669  ;;  %v1985_v62 = vmul.f32 %v2668_v27, %v3551_v13  ;;  %vm1990_vm2 = vweird.f32 %v2668_v27  ;;  %v1938_v60 = vmul.f32 1.442695, %v1892_v63  ;;  %vm3660_vm7 = vcmp.eq.f32.partialorder %v2008_v44, 8.507059e+37  ;;  %v2705_v63 = vld [vmem:[#allocation3 + $0x18] sm:$0x3] }
 0xf82   :  { %v3611_v4 = vpop.eup %2671  ;;  %v1957_v20 = vsel %vm1827_vm14, %v3601_v28, 0.0  ;;  %2677 = vrcp.f32 %v3614_v31  ;;  %v2040_v14 = vand.u32 2147483648, %v3614_v31  ;;  %vm1991_vm3 = vmor %vm1989_vm15, %vm1990_vm2  ;;  %v2038_v56 = vand.u32 2147483647, %v3614_v31 }
 0xf83   :  { %v3618_v34 = vpop.eup %2673  ;;  %v1986_v35 = vsub.f32 1.0, %v1985_v62  ;;  %v1958_v37 = vadd.f32 %v1957_v20, %v1956_v55  ;;  %v1959_v38 = vsel %vm1827_vm14, %v3611_v4, 0.0  ;;  %2679 = vpow2.f32 %v1902_v32 }
 0xf84   :  { %v1961_v47 = vsel %vm1827_vm14, %v3618_v34, 0.0  ;;  %v3633_v51 = vpop.eup %2675  ;;  %2681 = vpow2.f32 %v1914_v5  ;;  %v3646_v18 = vor.u32 1.1754944e-38, %v2040_v14  ;;  %v2704_v5 = vld [vmem:[#allocation3 + $0xc] sm:$0x3]  ;;  %vm2034_vm1 = vweird.f32 %v3614_v31 }
 0xf85   :  { %v1987_v2 = vmul.f32 %v2668_v27, %v1986_v35  ;;  %v1960_v42 = vadd.f32 %v1959_v38, %v1958_v37  ;;  %v2000_v53 = vmul.f32 %v3633_v51, %v3592_v7  ;;  %2683 = vpow2.f32 %v1926_v39 }
 0xf86   :  { %vm2005_vm5 = vweird.f32 %v3633_v51  ;;  %vm3700_vm11 = vcmp.eq.f32.partialorder %v2038_v56, 8.507059e+37 }
 0xf87   :  { %v1988_v52 = vadd.f32 %v2668_v27, %v1987_v2  ;;  %v3635_v0 = vadd.f32 %v1961_v47, %v1960_v42  ;;  %v2001_v21 = vsub.f32 1.0, %v2000_v53  ;;  %v2706_v2 = vld [vmem:[#allocation3 + $0x24] sm:$0x3]  ;;  %vm2006_vm9 = vmor %vm2004_vm4, %vm2005_vm5 }
 0xf88   :  { %v3649_v19 = vpop.eup %2677 }
 0xf89   :  { %v1992_v16 = vsel %vm1991_vm3, %v2668_v27, %v1988_v52  ;;  %2685 = vrcp.f32 %v3635_v0  ;;  %v2023_v22 = vand.u32 2147483647, %v3635_v0  ;;  %v3664_v62 = vpop.eup %2679  ;;  %v2002_v11 = vmul.f32 %v3633_v51, %v2001_v21 }
 0xf8a   :  { %v1997_v13 = vsel %vm3604_vm0, %v1996_v36, %v1992_v16  ;;  %v2030_v57 = vmul.f32 %v3649_v19, %v3614_v31  ;;  %v2025_v29 = vand.u32 2147483648, %v3635_v0  ;;  %2687 = vpow2.f32 %v1938_v60  ;;  %v2703_v36 = vld [vmem:[#allocation3] sm:$0x3] }
 0xf8b   :  { %v1998_v24 = vmul.f32 %v3520_v54, %v1997_v13  ;;  %v2074_v27 = vmul.f32 %v3525_v26, %v1997_v13  ;;  %v2080_v25 = vmul.f32 %v3529_v58, %v1997_v13  ;;  %v2086_v55 = vmul.f32 %v3534_v10, %v1997_v13  ;;  %v3670_v54 = vpop.eup %2681  ;;  %v2701_v26 = vld [vmem:[#allocation2] sm:$0x3] }
 0xf8c   :  { %v3674_v35 = vpop.eup %2683  ;;  %vm2035_vm8 = vweird.f32 %v3649_v19  ;;  %v2003_v13 = vadd.f32 %v3633_v51, %v2002_v11  ;;  %v2031_v21 = vsub.f32 1.0, %v2030_v57  ;;  %vm2019_vm12 = vweird.f32 %v3635_v0 }
 0xf8d   :  { %v2092_v58 = vmul.f32 %v2701_v26, %v1998_v24  ;;  %v2098_v10 = vmul.f32 %v2702_v30, %v2074_v27  ;;  %v2104_v20 = vmul.f32 %v2080_v25, %v3260_v43  ;;  %v2110_v32 = vmul.f32 %v2086_v55, %v3295_v48  ;;  %vm2036_vm13 = vmor %vm2034_vm1, %vm2035_vm8 }
 0xf8e   :  { %v2165_v37 = vmul.f32 %v2703_v36, %v1998_v24  ;;  %v2171_v38 = vmul.f32 %v2704_v5, %v2074_v27  ;;  %v2177_v39 = vmul.f32 %v2705_v63, %v2080_v25  ;;  %v2183_v14 = vmul.f32 %v2706_v2, %v2086_v55 }
 0xf8f   :  { %v3676_v42 = vpop.eup %2685  ;;  %v2117_v44 = vsel %vm114_vm6, %v2092_v58, 0.0  ;;  %v2118_v47 = vsel %vm114_vm6, %v2098_v10, 0.0  ;;  %v2120_v43 = vsel %vm114_vm6, %v2104_v20, 0.0  ;;  %v2122_v52 = vsel %vm114_vm6, %v2110_v32, 0.0 }
 0xf90   :  { %v2119_v48 = vadd.f32 %v2118_v47, %v2117_v44  ;;  %v2189_v45 = vsel %vm114_vm6, %v2165_v37, 0.0  ;;  %v2190_v53 = vsel %vm114_vm6, %v2171_v38, 0.0  ;;  %v2192_v16 = vsel %vm114_vm6, %v2177_v39, 0.0  ;;  %v3688_v24 = vpop.eup %2687  ;;  %v2709_v39 = vld [vmem:[#allocation2 + $0x1a] sm:$0x3] }
 0xf91   :  { %v2191_v60 = vadd.f32 %v2190_v53, %v2189_v45  ;;  %v2194_v25 = vsel %vm114_vm6, %v2183_v14, 0.0  ;;  %v2015_v55 = vmul.f32 %v3676_v42, %v3635_v0  ;;  %vm2020_vm10 = vweird.f32 %v3676_v42  ;;  %v2710_v14 = vld [vmem:[#allocation3 + $0x2] sm:$0x3]  ;;  %v2711_v47 = vld [vmem:[#allocation3 + $0xe] sm:$0x3] }
 0xf92   :  { %v2121_v27 = vadd.f32 %v2120_v43, %v2119_v48  ;;  %v2007_v11 = vsel %vm2006_vm9, %v3633_v51, %v2003_v13  ;;  %v2032_v57 = vmul.f32 %v3649_v19, %v2031_v21  ;;  %v1970_v30 = vsel %vm1827_vm14, %v3664_v62, 0.0  ;;  %v2712_v48 = vld [vmem:[#allocation3 + $0x1a] sm:$0x3]  ;;  %v2713_v45 = vld [vmem:[#allocation3 + $0x26] sm:$0x3]  ;;  %vm3761_vm0 = vmor %vm2019_vm12, %vm2020_vm10 }
 0xf93   :  { %v2193_v26 = vadd.f32 %v2192_v16, %v2191_v60  ;;  %v2012_v7 = vsel %vm3660_vm7, %v3629_v46, %v2007_v11  ;;  %v2016_v20 = vsub.f32 1.0, %v2015_v55  ;;  %v1971_v51 = vsel %vm1827_vm14, %v3670_v54, 0.0  ;;  %v2717_v0 = vld [vmem:[#allocation2 + $0x2a] sm:$0x3] }
 0xf94   :  { %v2123_v10 = vadd.f32 %v2122_v52, %v2121_v27  ;;  %v2013_v56 = vmul.f32 %v3543_v1, %v2012_v7  ;;  %v2075_v36 = vmul.f32 %v3549_v12, %v2012_v7  ;;  %v2081_v37 = vmul.f32 %v3555_v41, %v2012_v7  ;;  %v2707_v1 = vld [vmem:[#allocation2 + $0x2] sm:$0x3]  ;;  %v2708_v41 = vld [vmem:[#allocation2 + $0xe] sm:$0x3] }
 0xf95   :  { %v2195_v32 = vadd.f32 %v2194_v25, %v2193_v26  ;;  %v2087_v46 = vmul.f32 %v3559_v6, %v2012_v7  ;;  %v2033_v59 = vadd.f32 %v3649_v19, %v2032_v57  ;;  %v2017_v5 = vmul.f32 %v3676_v42, %v2016_v20 }
 0xf96   :  { %2159 = vst.msk [vmem:[%s3890_s6] sm:$0x3] %vm114_vm6, %v2123_v10  ;;  %v1972_v38 = vadd.f32 %v1971_v51, %v1970_v30  ;;  %v2093_v12 = vmul.f32 %v2707_v1, %v2013_v56  ;;  %v2099_v63 = vmul.f32 %v2708_v41, %v2075_v36  ;;  %v2105_v2 = vmul.f32 %v2709_v39, %v2081_v37 }
 0xf97   :  { %2529 = vst.msk [vmem:[%s3890_s6 + $0xc] sm:$0x3] %vm114_vm6, %v2195_v32  ;;  %v2166_v44 = vmul.f32 %v2710_v14, %v2013_v56  ;;  %v2111_v6 = vmul.f32 %v2087_v46, %v3297_v49  ;;  %v2172_v43 = vmul.f32 %v2711_v47, %v2075_v36  ;;  %v2178_v52 = vmul.f32 %v2712_v48, %v2081_v37 }
 0xf98   :  { %v2184_v53 = vmul.f32 %v2713_v45, %v2087_v46  ;;  %v2124_v60 = vsel %vm114_vm6, %v2093_v12, 0.0  ;;  %v2125_v16 = vsel %vm114_vm6, %v2099_v63, 0.0  ;;  %v2026_v21 = vor.u32 1.1754944e-38, %v2025_v29  ;;  %v2719_v63 = vld [vmem:[#allocation3 + $0x12] sm:$0x3] }
 0xf99   :  { %v2196_v13 = vsel %vm114_vm6, %v2166_v44, 0.0  ;;  %v2126_v27 = vadd.f32 %v2125_v16, %v2124_v60  ;;  %v2127_v25 = vsel %vm114_vm6, %v2105_v2, 0.0  ;;  %v2129_v49 = vsel %vm114_vm6, %v2111_v6, 0.0  ;;  %v2721_v44 = vld [vmem:[#allocation3 + $0x2a] sm:$0x3] }
 0xf9a   :  { %v2197_v55 = vsel %vm114_vm6, %v2172_v43, 0.0  ;;  %vm3741_vm15 = vcmp.eq.f32.partialorder %v2023_v22, 8.507059e+37  ;;  %v2199_v29 = vsel %vm114_vm6, %v2178_v52, 0.0  ;;  %v2037_v57 = vsel %vm2036_vm13, %v3649_v19, %v2033_v59 }
 0xf9b   :  { %v2198_v11 = vadd.f32 %v2197_v55, %v2196_v13  ;;  %v2018_v30 = vadd.f32 %v3676_v42, %v2017_v5  ;;  %v2128_v10 = vadd.f32 %v2127_v25, %v2126_v27  ;;  %v2201_v7 = vsel %vm114_vm6, %v2184_v53, 0.0  ;;  %v2716_v5 = vld [vmem:[#allocation2 + $0x1e] sm:$0x3] }
 0xf9c   :  { %v2042_v31 = vsel %vm3700_vm11, %v3646_v18, %v2037_v57  ;;  %v1973_v22 = vsel %vm1827_vm14, %v3674_v35, 0.0  ;;  %v1975_v47 = vsel %vm1827_vm14, %v3688_v24, 0.0 }
 0xf9d   :  { %v2200_v20 = vadd.f32 %v2199_v29, %v2198_v11  ;;  %v2043_v51 = vmul.f32 %v3566_v33, %v2042_v31  ;;  %v2077_v32 = vmul.f32 %v3568_v50, %v2042_v31  ;;  %v2083_v56 = vmul.f32 %v3576_v3, %v2042_v31  ;;  %v2714_v50 = vld [vmem:[#allocation2 + $0x6] sm:$0x3]  ;;  %v2715_v3 = vld [vmem:[#allocation2 + $0x12] sm:$0x3] }
 0xf9e   :  { %v2130_v58 = vadd.f32 %v2129_v49, %v2128_v10  ;;  %v2089_v18 = vmul.f32 %v3581_v17, %v2042_v31  ;;  %v2022_v36 = vsel %vm3761_vm0, %v3676_v42, %v2018_v30  ;;  %v1974_v33 = vadd.f32 %v1973_v22, %v1972_v38  ;;  %v2718_v17 = vld [vmem:[#allocation3 + $0x6] sm:$0x3]  ;;  %v2720_v42 = vld [vmem:[#allocation3 + $0x1e] sm:$0x3]  ;;  %v2723_v22 = vld [vmem:[#allocation2 + $0x10] sm:$0x3] }
 0xf9f   :  { %v2202_v37 = vadd.f32 %v2201_v7, %v2200_v20  ;;  %v2095_v46 = vmul.f32 %v2714_v50, %v2043_v51  ;;  %v2101_v59 = vmul.f32 %v2715_v3, %v2077_v32  ;;  %v2107_v1 = vmul.f32 %v2716_v5, %v2083_v56  ;;  %v2722_v7 = vld [vmem:[#allocation2 + $0x4] sm:$0x3]  ;;  %v2729_v3 = vld [vmem:[#allocation3 + $0x28] sm:$0x3] }
 0xfa0   :  { %2160 = vst.msk [vmem:[%s3890_s6 + $0x2] sm:$0x3] %vm114_vm6, %v2130_v58  ;;  %v2113_v12 = vmul.f32 %v2717_v0, %v2089_v18  ;;  %v2168_v41 = vmul.f32 %v2718_v17, %v2043_v51  ;;  %v2174_v39 = vmul.f32 %v2719_v63, %v2077_v32  ;;  %v2180_v38 = vmul.f32 %v2720_v42, %v2083_v56 }
 0xfa1   :  { %2530 = vst.msk [vmem:[%s3890_s6 + $0xe] sm:$0x3] %vm114_vm6, %v2202_v37  ;;  %v2138_v2 = vsel %vm114_vm6, %v2095_v46, 0.0  ;;  %v2139_v14 = vsel %vm114_vm6, %v2101_v59, 0.0  ;;  %v2186_v6 = vmul.f32 %v2721_v44, %v2089_v18  ;;  %v2141_v48 = vsel %vm114_vm6, %v2107_v1, 0.0 }
 0xfa2   :  { %v2140_v43 = vadd.f32 %v2139_v14, %v2138_v2  ;;  %v2210_v52 = vsel %vm114_vm6, %v2168_v41, 0.0  ;;  %v2211_v45 = vsel %vm114_vm6, %v2174_v39, 0.0  ;;  %v2143_v53 = vsel %vm114_vm6, %v2113_v12, 0.0  ;;  %v2728_v18 = vld [vmem:[#allocation3 + $0x1c] sm:$0x3] }
 0xfa3   :  { %v2212_v60 = vadd.f32 %v2211_v45, %v2210_v52  ;;  %v2213_v16 = vsel %vm114_vm6, %v2180_v38, 0.0  ;;  %v2027_v13 = vsel %vm3741_vm15, %v2026_v21, %v2022_v36  ;;  %v2215_v29 = vsel %vm114_vm6, %v2186_v6, 0.0  ;;  %v2724_v21 = vld [vmem:[#allocation2 + $0x1c] sm:$0x3] }
 0xfa4   :  { %v2142_v27 = vadd.f32 %v2141_v48, %v2140_v43  ;;  %v2028_v25 = vmul.f32 %v3589_v8, %v2027_v13  ;;  %v2076_v49 = vmul.f32 %v3601_v28, %v2027_v13  ;;  %v2082_v55 = vmul.f32 %v3611_v4, %v2027_v13  ;;  %v2725_v8 = vld [vmem:[#allocation2 + $0x28] sm:$0x3]  ;;  %v2726_v28 = vld [vmem:[#allocation3 + $0x4] sm:$0x3]  ;;  %v2727_v4 = vld [vmem:[#allocation3 + $0x10] sm:$0x3] }
 0xfa5   :  { %v2214_v11 = vadd.f32 %v2213_v16, %v2212_v60  ;;  %v2088_v57 = vmul.f32 %v3618_v34, %v2027_v13  ;;  %v3793_v30 = vadd.f32 %v1975_v47, %v1974_v33  ;;  %v1875_v50 = vsub.f32 %v3461_v61, %v3654_v9 }
 0xfa6   :  { %v2144_v10 = vadd.f32 %v2143_v53, %v2142_v27  ;;  %v2094_v31 = vmul.f32 %v2722_v7, %v2028_v25  ;;  %v2100_v26 = vmul.f32 %v2723_v22, %v2076_v49  ;;  %v2106_v20 = vmul.f32 %v2724_v21, %v2082_v55 }
 0xfa7   :  { %v2216_v51 = vadd.f32 %v2215_v29, %v2214_v11  ;;  %v2112_v32 = vmul.f32 %v2725_v8, %v2088_v57  ;;  %v2167_v56 = vmul.f32 %v2726_v28, %v2028_v25  ;;  %v2173_v19 = vmul.f32 %v2727_v4, %v2076_v49  ;;  %v2732_v8 = vld [vmem:[#allocation2 + $0x20] sm:$0x3] }
 0xfa8   :  { %2162 = vst.msk [vmem:[%s3890_s6 + $0x6] sm:$0x3] %vm114_vm6, %v2144_v10  ;;  %v2131_v34 = vsel %vm114_vm6, %v2094_v31, 0.0  ;;  %v2132_v58 = vsel %vm114_vm6, %v2100_v26, 0.0  ;;  %v2179_v36 = vmul.f32 %v2728_v18, %v2082_v55  ;;  %v2134_v46 = vsel %vm114_vm6, %v2106_v20, 0.0 }
 0xfa9   :  { %2532 = vst.msk [vmem:[%s3890_s6 + $0x12] sm:$0x3] %vm114_vm6, %v2216_v51  ;;  %v2133_v33 = vadd.f32 %v2132_v58, %v2131_v34  ;;  %v2203_v37 = vsel %vm114_vm6, %v2167_v56, 0.0  ;;  %v2185_v59 = vmul.f32 %v2729_v3, %v2088_v57  ;;  %v2204_v5 = vsel %vm114_vm6, %v2173_v19, 0.0  ;;  %v2730_v26 = vld [vmem:[#allocation2 + $0x8] sm:$0x3] }
 0xfaa   :  { %2689 = vrcp.f32 %v3793_v30  ;;  %v2136_v0 = vsel %vm114_vm6, %v2112_v32, 0.0  ;;  %v2205_v12 = vadd.f32 %v2204_v5, %v2203_v37  ;;  %v2206_v17 = vsel %vm114_vm6, %v2179_v36, 0.0  ;;  %v2731_v20 = vld [vmem:[#allocation2 + $0x14] sm:$0x3]  ;;  %v2733_v56 = vld [vmem:[#allocation3 + $0x8] sm:$0x3] }
 0xfab   :  { %v2135_v1 = vadd.f32 %v2134_v46, %v2133_v33  ;;  %v1881_v41 = vsub.f32 %v3471_v15, %v3654_v9  ;;  %v1887_v61 = vsub.f32 %v3485_v23, %v3654_v9  ;;  %v1893_v63 = vsub.f32 %v3625_v40, %v3654_v9  ;;  %v2734_v19 = vld [vmem:[#allocation3 + $0x14] sm:$0x3]  ;;  %v2737_v33 = vld [vmem:[#allocation3 + $0x2c] sm:$0x3] }
 0xfac   :  { %v2207_v42 = vadd.f32 %v2206_v17, %v2205_v12  ;;  %v1904_v38 = vmul.f32 1.442695, %v1875_v50  ;;  %v2208_v2 = vsel %vm114_vm6, %v2185_v59, 0.0  ;;  %v2055_v9 = vand.u32 2147483648, %v3793_v30 }
 0xfad   :  { %v2137_v39 = vadd.f32 %v2136_v0, %v2135_v1  ;;  %v1916_v14 = vmul.f32 1.442695, %v1881_v41  ;;  %v1928_v44 = vmul.f32 1.442695, %v1887_v61  ;;  %v1940_v15 = vmul.f32 1.442695, %v1893_v63 }
 0xfae   :  { %v2209_v6 = vadd.f32 %v2208_v2, %v2207_v42  ;;  %2691 = vpow2.f32 %v1904_v38  ;;  %v2053_v52 = vand.u32 2147483647, %v3793_v30  ;;  %vm2049_vm3 = vweird.f32 %v3793_v30 }
 0xfaf   :  { %2161 = vst.msk [vmem:[%s3890_s6 + $0x4] sm:$0x3] %vm114_vm6, %v2137_v39  ;;  %2693 = vpow2.f32 %v1916_v14  ;;  %v2056_v27 = vor.u32 1.1754944e-38, %v2055_v9 }
 0xfb0   :  { %v2690_v47 = vpop.eup %2689  ;;  %2531 = vst.msk [vmem:[%s3890_s6 + $0x10] sm:$0x3] %vm114_vm6, %v2209_v6  ;;  %2695 = vpow2.f32 %v1928_v44  ;;  %vm2054_vm5 = vcmp.eq.f32.partialorder %v2053_v52, 8.507059e+37  ;;  %v2738_v52 = vld [vmem:[#allocation2 + $0xa] sm:$0x3] }
 0xfb1   :  { %v2045_v23 = vmul.f32 %v2690_v47, %v3793_v30  ;;  %2697 = vpow2.f32 %v1940_v15  ;;  %vm2050_vm2 = vweird.f32 %v2690_v47 }
 0xfb2   :  { %vm2051_vm4 = vmor %vm2049_vm3, %vm2050_vm2 }
 0xfb3   :  { %v2046_v40 = vsub.f32 1.0, %v2045_v23 }
 0xfb4   :  { %v3830_v43 = vpop.eup %2691 }
 0xfb5   :  { %v2047_v48 = vmul.f32 %v2690_v47, %v2046_v40  ;;  %v3833_v45 = vpop.eup %2693  ;;  %v1977_v53 = vsel %vm1827_vm14, %v3830_v43, 0.0 }
 0xfb6   :  { %v3837_v60 = vpop.eup %2695  ;;  %v1978_v13 = vsel %vm1827_vm14, %v3833_v45, 0.0 }
 0xfb7   :  { %v2048_v16 = vadd.f32 %v2690_v47, %v2047_v48  ;;  %v1979_v25 = vadd.f32 %v1978_v13, %v1977_v53  ;;  %v2698_v49 = vpop.eup %2697  ;;  %v1980_v11 = vsel %vm1827_vm14, %v3837_v60, 0.0 }
 0xfb8   :  { %v1982_v22 = vsel %vm1827_vm14, %v2698_v49, 0.0 }
 0xfb9   :  { %v2052_v55 = vsel %vm2051_vm4, %v2690_v47, %v2048_v16  ;;  %v1981_v57 = vadd.f32 %v1980_v11, %v1979_v25  ;;  %v2739_v16 = vld [vmem:[#allocation2 + $0x16] sm:$0x3] }
 0xfba   :  { %v2057_v29 = vsel %vm2054_vm5, %v2056_v27, %v2052_v55  ;;  %v2740_v27 = vld [vmem:[#allocation2 + $0x22] sm:$0x3]  ;;  %v2741_v55 = vld [vmem:[#allocation3 + $0xa] sm:$0x3] }
 0xfbb   :  { %v2058_v10 = vmul.f32 %v3664_v62, %v2057_v29  ;;  %v2078_v7 = vmul.f32 %v3670_v54, %v2057_v29  ;;  %v2084_v30 = vmul.f32 %v3674_v35, %v2057_v29  ;;  %v2090_v31 = vmul.f32 %v3688_v24, %v2057_v29  ;;  %v2735_v62 = vld [vmem:[#allocation3 + $0x20] sm:$0x3]  ;;  %v2736_v54 = vld [vmem:[#allocation2 + $0x2c] sm:$0x3]  ;;  %v2742_v29 = vld [vmem:[#allocation3 + $0x16] sm:$0x3] }
 0xfbc   :  { %v1983_v28 = vadd.f32 %v1982_v22, %v1981_v57 }
 0xfbd   :  { %v2096_v21 = vmul.f32 %v2730_v26, %v2058_v10  ;;  %v2102_v51 = vmul.f32 %v2731_v20, %v2078_v7  ;;  %v2108_v32 = vmul.f32 %v2732_v8, %v2084_v30  ;;  %v2169_v4 = vmul.f32 %v2733_v56, %v2058_v10  ;;  %v2743_v10 = vld [vmem:[#allocation3 + $0x22] sm:$0x3] }
 0xfbe   :  { %v2175_v34 = vmul.f32 %v2734_v19, %v2078_v7  ;;  %v2181_v58 = vmul.f32 %v2735_v62, %v2084_v30  ;;  %v2114_v18 = vmul.f32 %v2736_v54, %v2090_v31  ;;  %v2187_v37 = vmul.f32 %v2737_v33, %v2090_v31  ;;  %v2744_v30 = vld [vmem:[#allocation2 + $0x2e] sm:$0x3] }
 0xfbf   :  { %v2145_v35 = vsel %vm114_vm6, %v2096_v21, 0.0  ;;  %v2146_v24 = vsel %vm114_vm6, %v2102_v51, 0.0  ;;  %v2217_v50 = vsel %vm114_vm6, %v2169_v4, 0.0  ;;  %v2148_v3 = vsel %vm114_vm6, %v2108_v32, 0.0 }
 0xfc0   :  { %v2147_v36 = vadd.f32 %v2146_v24, %v2145_v35  ;;  %v2218_v46 = vsel %vm114_vm6, %v2175_v34, 0.0  ;;  %2699 = vrcp.f32 %v1983_v28  ;;  %v2220_v1 = vsel %vm114_vm6, %v2181_v58, 0.0 }
 0xfc1   :  { %v2219_v59 = vadd.f32 %v2218_v46, %v2217_v50  ;;  %v2150_v0 = vsel %vm114_vm6, %v2114_v18, 0.0  ;;  %v2222_v41 = vsel %vm114_vm6, %v2187_v37, 0.0  ;;  %v2070_v38 = vand.u32 2147483648, %v1983_v28 }
 0xfc2   :  { %v2149_v5 = vadd.f32 %v2148_v3, %v2147_v36  ;;  %v2068_v14 = vand.u32 2147483647, %v1983_v28  ;;  %vm2064_vm7 = vweird.f32 %v1983_v28 }
 0xfc3   :  { %v2221_v12 = vadd.f32 %v2220_v1, %v2219_v59  ;;  %v2071_v6 = vor.u32 1.1754944e-38, %v2070_v38 }
 0xfc4   :  { %v2151_v17 = vadd.f32 %v2150_v0, %v2149_v5  ;;  %vm2069_vm1 = vcmp.eq.f32.partialorder %v2068_v14, 8.507059e+37 }
 0xfc5   :  { %v2223_v61 = vadd.f32 %v2222_v41, %v2221_v12 }
 0xfc6   :  { %2163 = vst.msk [vmem:[%s3890_s6 + $0x8] sm:$0x3] %vm114_vm6, %v2151_v17  ;;  %v2700_v63 = vpop.eup %2699 }
 0xfc7   :  { %2533 = vst.msk [vmem:[%s3890_s6 + $0x14] sm:$0x3] %vm114_vm6, %v2223_v61  ;;  %v2060_v39 = vmul.f32 %v2700_v63, %v1983_v28  ;;  %vm2065_vm14 = vweird.f32 %v2700_v63 }
 0xfc8   :  { %vm2066_vm8 = vmor %vm2064_vm7, %vm2065_vm14 }
 0xfc9   :  { %v2061_v42 = vsub.f32 1.0, %v2060_v39 }
 0xfcb   :  { %v2062_v2 = vmul.f32 %v2700_v63, %v2061_v42 }
 0xfcd   :  { %v2063_v44 = vadd.f32 %v2700_v63, %v2062_v2 }
 0xfcf   :  { %v2067_v15 = vsel %vm2066_vm8, %v2700_v63, %v2063_v44 }
 0xfd0   :  { %v2072_v47 = vsel %vm2069_vm1, %v2071_v6, %v2067_v15 }
 0xfd1   :  { %v2073_v23 = vmul.f32 %v3830_v43, %v2072_v47  ;;  %v2079_v40 = vmul.f32 %v3833_v45, %v2072_v47  ;;  %v2085_v9 = vmul.f32 %v3837_v60, %v2072_v47  ;;  %v2091_v48 = vmul.f32 %v2698_v49, %v2072_v47  ;;  %v2745_v49 = vld [vmem:[#allocation3 + $0x2e] sm:$0x3] }
 0xfd3   :  { %v2097_v53 = vmul.f32 %v2738_v52, %v2073_v23  ;;  %v2103_v13 = vmul.f32 %v2739_v16, %v2079_v40  ;;  %v2109_v25 = vmul.f32 %v2740_v27, %v2085_v9  ;;  %v2170_v11 = vmul.f32 %v2741_v55, %v2073_v23 }
 0xfd4   :  { %v2176_v57 = vmul.f32 %v2742_v29, %v2079_v40  ;;  %v2182_v7 = vmul.f32 %v2743_v10, %v2085_v9  ;;  %v2115_v31 = vmul.f32 %v2744_v30, %v2091_v48  ;;  %v2188_v22 = vmul.f32 %v2745_v49, %v2091_v48 }
 0xfd5   :  { %v2152_v43 = vsel %vm114_vm6, %v2097_v53, 0.0  ;;  %v2153_v45 = vsel %vm114_vm6, %v2103_v13, 0.0  ;;  %v2224_v26 = vsel %vm114_vm6, %v2170_v11, 0.0  ;;  %v2155_v20 = vsel %vm114_vm6, %v2109_v25, 0.0 }
 0xfd6   :  { %v2154_v60 = vadd.f32 %v2153_v45, %v2152_v43  ;;  %v2225_v21 = vsel %vm114_vm6, %v2176_v57, 0.0  ;;  %v2227_v32 = vsel %vm114_vm6, %v2182_v7, 0.0  ;;  %v2157_v28 = vsel %vm114_vm6, %v2115_v31, 0.0 }
 0xfd7   :  { %v2226_v51 = vadd.f32 %v2225_v21, %v2224_v26  ;;  %v2229_v19 = vsel %vm114_vm6, %v2188_v22, 0.0 }
 0xfd8   :  { %v2156_v8 = vadd.f32 %v2155_v20, %v2154_v60 }
 0xfd9   :  { %v2228_v56 = vadd.f32 %v2227_v32, %v2226_v51 }
 0xfda   :  { %v2158_v4 = vadd.f32 %v2157_v28, %v2156_v8 }
 0xfdb   :  { %v2230_v34 = vadd.f32 %v2229_v19, %v2228_v56 }
 0xfdc   :  { %2164 = vst.msk [vmem:[%s3890_s6 + $0xa] sm:$0x3] %vm114_vm6, %v2158_v4 }
 0xfdd   :  { %2534 = vst.msk [vmem:[%s3890_s6 + $0x16] sm:$0x3] %vm114_vm6, %v2230_v34 }

</bundles_post_ra>
